<compile_context>
chip_gen: v6e
topology: v6e:2x2x1
jax: 0.10.0
libtpu: 0.0.40
codegen_flags: <defaults>
</compile_context>

<pallas_src>
import functools

import jax
import jax.numpy as jnp
from jax import lax
from jax.experimental import pallas as pl
from jax.experimental.pallas import tpu as pltpu


def _round_up(x, m):
    return ((x + m - 1) // m) * m


def _pad_gate_axis(w, h, hp):
    """Pad the trailing 4*h gate axis to 4*hp, per-gate (order i,f,g,o)."""
    lead = w.shape[:-1]
    w4 = w.reshape(*lead, 4, h)
    pad = [(0, 0)] * len(lead) + [(0, 0), (0, hp - h)]
    return jnp.pad(w4, pad).reshape(*lead, 4 * hp)


def _sigmoid(x):
    # One EUP transcendental (tanh) instead of exp + reciprocal.
    return 0.5 * jnp.tanh(0.5 * x) + 0.5


def _lstm_rollout_kernel(gx_ref, whh_ref, h0_ref, c0_ref,
                         h_out_ref, c_out_ref, h_sc, *, tc, t_real):
    """One time-chunk (tc steps) of the fused LSTM rollout.

    gx_ref:    (Tc, Bp, 4Hp) f32   precomputed  x_t @ W_ih^T + b
    whh_ref:   (Hp, 4Hp)     bf16  W_hh^T, VMEM-resident across all chunks
    h0_ref/c0_ref: (Bp, Hp)  f32   initial state (read at chunk == 0 only)
    h_out_ref: (Tc, Bp, Hp)  f32   h_t for every step of this chunk
    c_out_ref: (Bp, Hp)      f32   resident output; carries c across chunks
    h_sc:      (Bp, Hp)      f32   VMEM scratch carrying h across chunks
    """
    chunk = pl.program_id(0)

    @pl.when(chunk == 0)
    def _():
        h_sc[...] = h0_ref[...]
        c_out_ref[...] = c0_ref[...]

    hp = h_sc.shape[1]
    needs_mask = (t_real % tc) != 0   # static: only last chunk may be padded

    def step(tt, carry):
        h, c = carry
        # Only the recurrent matmul lives in the loop (bf16 in, f32 accumulate).
        gates = gx_ref[tt] + jnp.dot(h.astype(whh_ref.dtype), whh_ref[...],
                                     preferred_element_type=jnp.float32)
        # Hp is a multiple of 128 -> each gate slice is a whole-vreg view.
        i_g = _sigmoid(gates[:, 0 * hp:1 * hp])
        f_g = _sigmoid(gates[:, 1 * hp:2 * hp])
        g_g = jnp.tanh(gates[:, 2 * hp:3 * hp])
        o_g = _sigmoid(gates[:, 3 * hp:4 * hp])
        c_new = f_g * c + i_g * g_g
        h_new = o_g * jnp.tanh(c_new)
        if needs_mask:
            # Freeze the state on padded tail steps so they never perturb the
            # real recurrence.  (Their h_out rows are sliced away outside.)
            valid = (chunk * tc + tt) < t_real
            h_new = jnp.where(valid, h_new, h)
            c_new = jnp.where(valid, c_new, c)
        h_out_ref[tt] = h_new
        return h_new, c_new

    h_fin, c_fin = lax.fori_loop(0, tc, step, (h_sc[...], c_out_ref[...]),
                                 unroll=True)
    h_sc[...] = h_fin
    c_out_ref[...] = c_fin


def _lstm_rollout_pallas(gates_x, w_hh_t_p, h0, c0, t_real, tc):
    """Fused LSTM rollout over Tp = n_chunks * tc padded timesteps.

    gates_x: (Tp, Bp, 4Hp) f32, w_hh_t_p: (Hp, 4Hp) bf16, h0/c0: (Bp, Hp) f32.
    Returns (h_all (Tp, Bp, Hp) f32, c_final (Bp, Hp) f32).
    """
    Tp, Bp, four_hp = gates_x.shape
    Hp = four_hp // 4
    n_chunks = Tp // tc

    cost = pl.CostEstimate(
        flops=2 * t_real * Bp * Hp * four_hp,
        transcendentals=5 * t_real * Bp * Hp,
        bytes_accessed=4 * (gates_x.size + w_hh_t_p.size // 2
                            + 2 * Bp * Hp + (Tp + 1) * Bp * Hp),
    )

    kernel = functools.partial(_lstm_rollout_kernel, tc=tc, t_real=t_real)

    return pl.pallas_call(
        kernel,
        out_shape=(jax.ShapeDtypeStruct((Tp, Bp, Hp), jnp.float32),
                   jax.ShapeDtypeStruct((Bp, Hp), jnp.float32)),
        grid_spec=pltpu.PrefetchScalarGridSpec(
            num_scalar_prefetch=0,
            grid=(n_chunks,),
            in_specs=[
                pl.BlockSpec((tc, Bp, four_hp), lambda t: (t, 0, 0)),  # streamed
                pl.BlockSpec((Hp, four_hp), lambda t: (0, 0)),         # resident
                pl.BlockSpec((Bp, Hp), lambda t: (0, 0)),              # resident
                pl.BlockSpec((Bp, Hp), lambda t: (0, 0)),              # resident
            ],
            out_specs=[pl.BlockSpec((tc, Bp, Hp), lambda t: (t, 0, 0)),
                       pl.BlockSpec((Bp, Hp), lambda t: (0, 0))],
            scratch_shapes=[pltpu.VMEM((Bp, Hp), jnp.float32)],
        ),
        # Time is a true recurrence -> "arbitrary".  (A leading "parallel"
        # batch-chunk axis for v7x's 2 TCs only pays off once Bp >= 16.)
        compiler_params=pltpu.CompilerParams(
            dimension_semantics=("arbitrary",)),
        cost_estimate=cost,
    )(gates_x, w_hh_t_p, h0, c0)


@jax.jit
def _controller_rollout(X, h, c, w_ih_t_p, w_hh_t_p, b_p):
    """X: (T, B, E) f32 (zero rows for x=None steps); h/c: (B, H) f32.
    Returns (h_all (T, B, H) f32, c_final (B, H) f32)."""
    T, B, _ = X.shape
    H = h.shape[1]
    Hp = w_hh_t_p.shape[0]
    Bp = max(8, _round_up(B, 8))
    Tc = min(T, 8)                     # timesteps per grid iteration
    Tp = _round_up(T, Tc)

    # Pad the SMALL input (time + batch) before the projection so the large
    # gate-preactivation tensor is produced already padded (no extra HBM pass).
    Xp = jnp.pad(X, ((0, Tp - T), (0, Bp - B), (0, 0)))

    # Input projection hoisted out of the recurrence: one bf16 matmul for all
    # timesteps, f32 accumulation, bias folded in.
    gates_x = jnp.einsum(
        "tbe,ef->tbf", Xp.astype(jnp.bfloat16), w_ih_t_p,
        preferred_element_type=jnp.float32) + b_p[None, None, :]

    h0 = jnp.pad(h, ((0, Bp - B), (0, Hp - H)))
    c0 = jnp.pad(c, ((0, Bp - B), (0, Hp - H)))

    h_all, c_fin = _lstm_rollout_pallas(gates_x, w_hh_t_p, h0, c0, T, Tc)
    return h_all[:T, :B, :H], c_fin[:B, :H]


class Controller:
    """JAX/Pallas re-implementation of the PyTorch NTM Controller
    (dictionary_size=None path: no embedding lookup)."""

    def __init__(self, embedding_size, hidden_size, key, dictionary_size=None):
        if dictionary_size is not None:
            # TODO(synk): nn.Embedding lookup path (dictionary_size) not implemented.
            raise NotImplementedError("embedding path not implemented")
        self.embedding_size = embedding_size
        self.hidden_size = hidden_size

        H, E = hidden_size, embedding_size
        Hp = max(128, _round_up(H, 128))      # lane-dense hidden size
        self._Hp = Hp

        k = jax.random.split(key, 6)
        s = 1.0 / jnp.sqrt(H)
        # PyTorch LSTMCell init; weights stored transposed (in_features, 4H).
        self.w_ih_t = jax.random.uniform(k[0], (E, 4 * H), jnp.float32, -s, s)
        self.w_hh_t = jax.random.uniform(k[1], (H, 4 * H), jnp.float32, -s, s)
        b_ih = jax.random.uniform(k[2], (4 * H,), jnp.float32, -s, s)
        b_hh = jax.random.uniform(k[3], (4 * H,), jnp.float32, -s, s)
        self.b = b_ih + b_hh
        self.h_bias = jax.random.normal(k[4], (H,), jnp.float32)
        self.c_bias = jax.random.normal(k[5], (H,), jnp.float32)

        # Padded bf16 compute copies.  Padded gate columns have zero weight and
        # zero bias, so padded hidden units stay exactly 0 through the rollout.
        self._w_ih_t_p = _pad_gate_axis(self.w_ih_t, H, Hp).astype(jnp.bfloat16)
        w_hh_rows = jnp.pad(self.w_hh_t, ((0, Hp - H), (0, 0)))
        self._w_hh_t_p = _pad_gate_axis(w_hh_rows, H, Hp).astype(jnp.bfloat16)
        self._b_p = _pad_gate_axis(self.b, H, Hp)

        self._expected_batch_size = None
        self.h = None
        self.c = None

    def reset(self, batch_size):
        self._expected_batch_size = batch_size
        self.h = jnp.tile(self.h_bias[None, :], (batch_size, 1))
        self.c = jnp.tile(self.c_bias[None, :], (batch_size, 1))

    def forward_sequence(self, xs):
        """Run len(xs) consecutive controller steps (entries may be None) in a
        single fused Pallas call.  Returns h for every step: (T, B, H)."""
        B, E = self._expected_batch_size, self.embedding_size
        rows = []
        for x in xs:
            if x is None:
                rows.append(jnp.zeros((B, E), jnp.float32))
            else:
                assert x.shape == (B, E)
                rows.append(x.astype(jnp.float32))
        X = jnp.stack(rows, axis=0)
        h_all, c_fin = _controller_rollout(X, self.h, self.c,
                                           self._w_ih_t_p, self._w_hh_t_p,
                                           self._b_p)
        self.h = h_all[-1]
        self.c = c_fin
        return h_all

    def forward(self, x):
        # Single-step semantics of the PyTorch module (T=1 fused rollout).
        return self.forward_sequence([x])[0]

    def __call__(self, x):
        return self.forward(x)


def _reference_rollout(xs, h, c, w_ih_t, w_hh_t, b):
    """Pure-JAX step-by-step reference (bf16 matmul inputs, f32 accumulation
    and f32 elementwise -- same numerics contract as the kernel)."""
    def bf(a):
        return a.astype(jnp.bfloat16).astype(jnp.float32)

    H = h.shape[1]
    hs = []
    for x in xs:
        e = (jnp.zeros((h.shape[0], w_ih_t.shape[0]), jnp.float32)
             if x is None else x)
        gates = bf(e) @ bf(w_ih_t) + bf(h) @ bf(w_hh_t) + b[None, :]
        i = jax.nn.sigmoid(gates[:, 0 * H:1 * H])
        f = jax.nn.sigmoid(gates[:, 1 * H:2 * H])
        g = jnp.tanh(gates[:, 2 * H:3 * H])
        o = jax.nn.sigmoid(gates[:, 3 * H:4 * H])
        c = f * c + i * g
        h = o * jnp.tanh(c)
        hs.append(h)
    return jnp.stack(hs, 0), h, c


if __name__ == "__main__":
    batch = 2
    embedding_size = 16
    hidden_size = 32
    seq_len = 8

    key = jax.random.PRNGKey(0)
    k_params, k_x, k_x2 = jax.random.split(key, 3)

    ctrl = Controller(embedding_size, hidden_size, k_params)
    ctrl.reset(batch)

    xs_arr = jax.random.normal(k_x, (seq_len, batch, embedding_size),
                               jnp.float32)
    xs = [xs_arr[t] for t in range(seq_len)]
    xs[2] = None   # x=None steps, as an NTM produces during memory phases
    xs[5] = None

    # Pure-JAX reference on the freshly reset state.
    h_ref_all, h_ref_fin, c_ref_fin = _reference_rollout(
        xs, ctrl.h, ctrl.c, ctrl.w_ih_t, ctrl.w_hh_t, ctrl.b)

    # --- fused multi-step rollout: one pallas_call, time-chunked grid ---
    h_all = ctrl.forward_sequence(xs)
    jax.block_until_ready(h_all)
    jax.block_until_ready(ctrl.c)

    assert h_all.shape == (seq_len, batch, hidden_size)
    assert jnp.allclose(h_all, h_ref_all, atol=1e-3, rtol=1e-3)
    assert jnp.allclose(ctrl.h, h_ref_fin, atol=1e-3, rtol=1e-3)
    assert jnp.allclose(ctrl.c, c_ref_fin, atol=1e-3, rtol=1e-3)

    # --- T not a multiple of the time-chunk (exercises the masked tail) ---
    seq_len2 = 11
    ctrl.reset(batch)
    xs2_arr = jax.random.normal(k_x2, (seq_len2, batch, embedding_size),
                                jnp.float32)
    xs2 = [xs2_arr[t] for t in range(seq_len2)]
    xs2[4] = None
    h2_ref_all, h2_ref_fin, c2_ref_fin = _reference_rollout(
        xs2, ctrl.h, ctrl.c, ctrl.w_ih_t, ctrl.w_hh_t, ctrl.b)
    h2_all = ctrl.forward_sequence(xs2)
    jax.block_until_ready(h2_all)
    assert h2_all.shape == (seq_len2, batch, hidden_size)
    assert jnp.allclose(h2_all, h2_ref_all, atol=1e-3, rtol=1e-3)
    assert jnp.allclose(ctrl.h, h2_ref_fin, atol=1e-3, rtol=1e-3)
    assert jnp.allclose(ctrl.c, c2_ref_fin, atol=1e-3, rtol=1e-3)

    # --- single-step forward (original Controller.forward semantics) ---
    ctrl.reset(batch)
    h1_ref, _, c1_ref = _reference_rollout([xs[0]], ctrl.h, ctrl.c,
                                           ctrl.w_ih_t, ctrl.w_hh_t, ctrl.b)
    h1 = ctrl(xs[0])
    jax.block_until_ready(h1)
    assert h1.shape == (batch, hidden_size)
    assert jnp.allclose(h1, h1_ref[0], atol=1e-3, rtol=1e-3)
    assert jnp.allclose(ctrl.c, c1_ref, atol=1e-3, rtol=1e-3)

    h2 = ctrl(None)   # x=None single-step path
    jax.block_until_ready(h2)
    assert h2.shape == (batch, hidden_size)

    print("KERNEL_OK")
</pallas_src>

<mosaic_0001>
module attributes {stable_mosaic.version = 11 : i64} {
  func.func @_lstm_rollout_kernel(%arg0: i32, %arg1: memref<8x8x512xf32, #tpu.memory_space<vmem>>, %arg2: memref<128x512xbf16, #tpu.memory_space<vmem>>, %arg3: memref<8x128xf32, #tpu.memory_space<vmem>>, %arg4: memref<8x128xf32, #tpu.memory_space<vmem>>, %arg5: memref<8x8x128xf32, #tpu.memory_space<vmem>>, %arg6: memref<8x128xf32, #tpu.memory_space<vmem>>, %arg7: memref<8x128xf32, #tpu.memory_space<vmem>>) attributes {dimension_semantics = [#tpu.dimension_semantics<arbitrary>], iteration_bounds = array<i64: 1>, scalar_prefetch = 0 : i64, scratch_operands = 1 : i64, tpu.core_type = #tpu.core_type<tc>, window_params = [{transform_indices = @transform_0, window_bounds = array<i64: 8, 8, 512>}, {pipeline_mode = #tpu.pipeline_mode<synchronous>, transform_indices = @transform_1, window_bounds = array<i64: 128, 512>}, {pipeline_mode = #tpu.pipeline_mode<synchronous>, transform_indices = @transform_2, window_bounds = array<i64: 8, 128>}, {pipeline_mode = #tpu.pipeline_mode<synchronous>, transform_indices = @transform_3, window_bounds = array<i64: 8, 128>}, {transform_indices = @transform_4, window_bounds = array<i64: 8, 8, 128>}, {pipeline_mode = #tpu.pipeline_mode<synchronous>, transform_indices = @transform_5, window_bounds = array<i64: 8, 128>}]} {
    %c0_i32 = arith.constant 0 : i32
    %0 = arith.cmpi eq, %arg0, %c0_i32 : i32
    %1 = arith.extui %0 : i1 to i32
    %c0_i32_0 = arith.constant 0 : i32
    %2 = arith.cmpi ne, %1, %c0_i32_0 : i32
    scf.if %2 {
      %c0_136 = arith.constant 0 : index
      %c0_137 = arith.constant 0 : index
      %343 = vector.load %arg3[%c0_136, %c0_137] : memref<8x128xf32, #tpu.memory_space<vmem>>, vector<8x128xf32>
      %c0_138 = arith.constant 0 : index
      %c0_139 = arith.constant 0 : index
      %344 = vector.load %arg7[%c0_138, %c0_139] : memref<8x128xf32, #tpu.memory_space<vmem>>, vector<8x128xf32>
      tpu.vector_store %arg7[%c0_138, %c0_139], %343 {strides = array<i32>} : memref<8x128xf32, #tpu.memory_space<vmem>>, vector<8x128xf32>,
      %c0_140 = arith.constant 0 : index
      %c0_141 = arith.constant 0 : index
      %345 = vector.load %arg4[%c0_140, %c0_141] : memref<8x128xf32, #tpu.memory_space<vmem>>, vector<8x128xf32>
      %c0_142 = arith.constant 0 : index
      %c0_143 = arith.constant 0 : index
      %346 = vector.load %arg6[%c0_142, %c0_143] : memref<8x128xf32, #tpu.memory_space<vmem>>, vector<8x128xf32>
      tpu.vector_store %arg6[%c0_142, %c0_143], %345 {strides = array<i32>} : memref<8x128xf32, #tpu.memory_space<vmem>>, vector<8x128xf32>,
    } else {
    }
    %c0 = arith.constant 0 : index
    %c0_1 = arith.constant 0 : index
    %3 = vector.load %arg7[%c0, %c0_1] : memref<8x128xf32, #tpu.memory_space<vmem>>, vector<8x128xf32>
    %c0_2 = arith.constant 0 : index
    %c0_3 = arith.constant 0 : index
    %4 = vector.load %arg6[%c0_2, %c0_3] : memref<8x128xf32, #tpu.memory_space<vmem>>, vector<8x128xf32>
    %c0_i32_4 = arith.constant 0 : i32
    %5 = arith.index_cast %c0_i32_4 : i32 to index
    %c0_5 = arith.constant 0 : index
    %c0_6 = arith.constant 0 : index
    %6 = vector.load %arg1[%5, %c0_5, %c0_6] : memref<8x8x512xf32, #tpu.memory_space<vmem>>, vector<1x8x512xf32>
    %7 = vector.shape_cast %6 : vector<1x8x512xf32> to vector<8x512xf32>
    %8 = arith.truncf %3 : vector<8x128xf32> to vector<8x128xbf16>
    %c0_7 = arith.constant 0 : index
    %c0_8 = arith.constant 0 : index
    %9 = vector.load %arg2[%c0_7, %c0_8] : memref<128x512xbf16, #tpu.memory_space<vmem>>, vector<128x512xbf16>
    %cst = arith.constant dense<0.000000e+00> : vector<8x512xf32>
    %10 = tpu.matmul %8, %9, %cst {dimension_numbers = #tpu.dot_dimension_numbers<[1], [0], [0], [1], [0, 0, 1, 1], [], []>} : vector<8x128xbf16>, vector<128x512xbf16>, vector<8x512xf32> -> vector<8x512xf32>
    %11 = arith.addf %7, %10 : vector<8x512xf32>
    %12 = vector.extract_strided_slice %11 {offsets = [0, 0], sizes = [8, 128], strides = [1, 1]} : vector<8x512xf32> to vector<8x128xf32>
    %cst_9 = arith.constant 5.000000e-01 : f32
    %13 = vector.broadcast %cst_9 : f32 to vector<8x128xf32>
    %14 = arith.mulf %13, %12 : vector<8x128xf32>
    %15 = math.tanh %14 : vector<8x128xf32>
    %cst_10 = arith.constant 5.000000e-01 : f32
    %16 = vector.broadcast %cst_10 : f32 to vector<8x128xf32>
    %17 = arith.mulf %16, %15 : vector<8x128xf32>
    %cst_11 = arith.constant 5.000000e-01 : f32
    %18 = vector.broadcast %cst_11 : f32 to vector<8x128xf32>
    %19 = arith.addf %17, %18 : vector<8x128xf32>
    %20 = vector.extract_strided_slice %11 {offsets = [0, 128], sizes = [8, 128], strides = [1, 1]} : vector<8x512xf32> to vector<8x128xf32>
    %cst_12 = arith.constant 5.000000e-01 : f32
    %21 = vector.broadcast %cst_12 : f32 to vector<8x128xf32>
    %22 = arith.mulf %21, %20 : vector<8x128xf32>
    %23 = math.tanh %22 : vector<8x128xf32>
    %cst_13 = arith.constant 5.000000e-01 : f32
    %24 = vector.broadcast %cst_13 : f32 to vector<8x128xf32>
    %25 = arith.mulf %24, %23 : vector<8x128xf32>
    %cst_14 = arith.constant 5.000000e-01 : f32
    %26 = vector.broadcast %cst_14 : f32 to vector<8x128xf32>
    %27 = arith.addf %25, %26 : vector<8x128xf32>
    %28 = vector.extract_strided_slice %11 {offsets = [0, 256], sizes = [8, 128], strides = [1, 1]} : vector<8x512xf32> to vector<8x128xf32>
    %29 = math.tanh %28 : vector<8x128xf32>
    %30 = vector.extract_strided_slice %11 {offsets = [0, 384], sizes = [8, 128], strides = [1, 1]} : vector<8x512xf32> to vector<8x128xf32>
    %cst_15 = arith.constant 5.000000e-01 : f32
    %31 = vector.broadcast %cst_15 : f32 to vector<8x128xf32>
    %32 = arith.mulf %31, %30 : vector<8x128xf32>
    %33 = math.tanh %32 : vector<8x128xf32>
    %cst_16 = arith.constant 5.000000e-01 : f32
    %34 = vector.broadcast %cst_16 : f32 to vector<8x128xf32>
    %35 = arith.mulf %34, %33 : vector<8x128xf32>
    %cst_17 = arith.constant 5.000000e-01 : f32
    %36 = vector.broadcast %cst_17 : f32 to vector<8x128xf32>
    %37 = arith.addf %35, %36 : vector<8x128xf32>
    %38 = arith.mulf %27, %4 : vector<8x128xf32>
    %39 = arith.mulf %19, %29 : vector<8x128xf32>
    %40 = arith.addf %38, %39 : vector<8x128xf32>
    %41 = math.tanh %40 : vector<8x128xf32>
    %42 = arith.mulf %37, %41 : vector<8x128xf32>
    %43 = arith.index_cast %c0_i32_4 : i32 to index
    %c0_18 = arith.constant 0 : index
    %c0_19 = arith.constant 0 : index
    %44 = vector.load %arg5[%43, %c0_18, %c0_19] : memref<8x8x128xf32, #tpu.memory_space<vmem>>, vector<1x8x128xf32>
    %45 = vector.shape_cast %44 : vector<1x8x128xf32> to vector<8x128xf32>
    %46 = vector.shape_cast %42 : vector<8x128xf32> to vector<1x8x128xf32>
    tpu.vector_store %arg5[%43, %c0_18, %c0_19], %46 {strides = array<i32>} : memref<8x8x128xf32, #tpu.memory_space<vmem>>, vector<1x8x128xf32>,
    %c1_i32 = arith.constant 1 : i32
    %47 = arith.index_cast %c1_i32 : i32 to index
    %c0_20 = arith.constant 0 : index
    %c0_21 = arith.constant 0 : index
    %48 = vector.load %arg1[%47, %c0_20, %c0_21] : memref<8x8x512xf32, #tpu.memory_space<vmem>>, vector<1x8x512xf32>
    %49 = vector.shape_cast %48 : vector<1x8x512xf32> to vector<8x512xf32>
    %50 = arith.truncf %42 : vector<8x128xf32> to vector<8x128xbf16>
    %c0_22 = arith.constant 0 : index
    %c0_23 = arith.constant 0 : index
    %51 = vector.load %arg2[%c0_22, %c0_23] : memref<128x512xbf16, #tpu.memory_space<vmem>>, vector<128x512xbf16>
    %cst_24 = arith.constant dense<0.000000e+00> : vector<8x512xf32>
    %52 = tpu.matmul %50, %51, %cst_24 {dimension_numbers = #tpu.dot_dimension_numbers<[1], [0], [0], [1], [0, 0, 1, 1], [], []>} : vector<8x128xbf16>, vector<128x512xbf16>, vector<8x512xf32> -> vector<8x512xf32>
    %53 = arith.addf %49, %52 : vector<8x512xf32>
    %54 = vector.extract_strided_slice %53 {offsets = [0, 0], sizes = [8, 128], strides = [1, 1]} : vector<8x512xf32> to vector<8x128xf32>
    %cst_25 = arith.constant 5.000000e-01 : f32
    %55 = vector.broadcast %cst_25 : f32 to vector<8x128xf32>
    %56 = arith.mulf %55, %54 : vector<8x128xf32>
    %57 = math.tanh %56 : vector<8x128xf32>
    %cst_26 = arith.constant 5.000000e-01 : f32
    %58 = vector.broadcast %cst_26 : f32 to vector<8x128xf32>
    %59 = arith.mulf %58, %57 : vector<8x128xf32>
    %cst_27 = arith.constant 5.000000e-01 : f32
    %60 = vector.broadcast %cst_27 : f32 to vector<8x128xf32>
    %61 = arith.addf %59, %60 : vector<8x128xf32>
    %62 = vector.extract_strided_slice %53 {offsets = [0, 128], sizes = [8, 128], strides = [1, 1]} : vector<8x512xf32> to vector<8x128xf32>
    %cst_28 = arith.constant 5.000000e-01 : f32
    %63 = vector.broadcast %cst_28 : f32 to vector<8x128xf32>
    %64 = arith.mulf %63, %62 : vector<8x128xf32>
    %65 = math.tanh %64 : vector<8x128xf32>
    %cst_29 = arith.constant 5.000000e-01 : f32
    %66 = vector.broadcast %cst_29 : f32 to vector<8x128xf32>
    %67 = arith.mulf %66, %65 : vector<8x128xf32>
    %cst_30 = arith.constant 5.000000e-01 : f32
    %68 = vector.broadcast %cst_30 : f32 to vector<8x128xf32>
    %69 = arith.addf %67, %68 : vector<8x128xf32>
    %70 = vector.extract_strided_slice %53 {offsets = [0, 256], sizes = [8, 128], strides = [1, 1]} : vector<8x512xf32> to vector<8x128xf32>
    %71 = math.tanh %70 : vector<8x128xf32>
    %72 = vector.extract_strided_slice %53 {offsets = [0, 384], sizes = [8, 128], strides = [1, 1]} : vector<8x512xf32> to vector<8x128xf32>
    %cst_31 = arith.constant 5.000000e-01 : f32
    %73 = vector.broadcast %cst_31 : f32 to vector<8x128xf32>
    %74 = arith.mulf %73, %72 : vector<8x128xf32>
    %75 = math.tanh %74 : vector<8x128xf32>
    %cst_32 = arith.constant 5.000000e-01 : f32
    %76 = vector.broadcast %cst_32 : f32 to vector<8x128xf32>
    %77 = arith.mulf %76, %75 : vector<8x128xf32>
    %cst_33 = arith.constant 5.000000e-01 : f32
    %78 = vector.broadcast %cst_33 : f32 to vector<8x128xf32>
    %79 = arith.addf %77, %78 : vector<8x128xf32>
    %80 = arith.mulf %69, %40 : vector<8x128xf32>
    %81 = arith.mulf %61, %71 : vector<8x128xf32>
    %82 = arith.addf %80, %81 : vector<8x128xf32>
    %83 = math.tanh %82 : vector<8x128xf32>
    %84 = arith.mulf %79, %83 : vector<8x128xf32>
    %85 = arith.index_cast %c1_i32 : i32 to index
    %c0_34 = arith.constant 0 : index
    %c0_35 = arith.constant 0 : index
    %86 = vector.load %arg5[%85, %c0_34, %c0_35] : memref<8x8x128xf32, #tpu.memory_space<vmem>>, vector<1x8x128xf32>
    %87 = vector.shape_cast %86 : vector<1x8x128xf32> to vector<8x128xf32>
    %88 = vector.shape_cast %84 : vector<8x128xf32> to vector<1x8x128xf32>
    tpu.vector_store %arg5[%85, %c0_34, %c0_35], %88 {strides = array<i32>} : memref<8x8x128xf32, #tpu.memory_space<vmem>>, vector<1x8x128xf32>,
    %c2_i32 = arith.constant 2 : i32
    %89 = arith.index_cast %c2_i32 : i32 to index
    %c0_36 = arith.constant 0 : index
    %c0_37 = arith.constant 0 : index
    %90 = vector.load %arg1[%89, %c0_36, %c0_37] : memref<8x8x512xf32, #tpu.memory_space<vmem>>, vector<1x8x512xf32>
    %91 = vector.shape_cast %90 : vector<1x8x512xf32> to vector<8x512xf32>
    %92 = arith.truncf %84 : vector<8x128xf32> to vector<8x128xbf16>
    %c0_38 = arith.constant 0 : index
    %c0_39 = arith.constant 0 : index
    %93 = vector.load %arg2[%c0_38, %c0_39] : memref<128x512xbf16, #tpu.memory_space<vmem>>, vector<128x512xbf16>
    %cst_40 = arith.constant dense<0.000000e+00> : vector<8x512xf32>
    %94 = tpu.matmul %92, %93, %cst_40 {dimension_numbers = #tpu.dot_dimension_numbers<[1], [0], [0], [1], [0, 0, 1, 1], [], []>} : vector<8x128xbf16>, vector<128x512xbf16>, vector<8x512xf32> -> vector<8x512xf32>
    %95 = arith.addf %91, %94 : vector<8x512xf32>
    %96 = vector.extract_strided_slice %95 {offsets = [0, 0], sizes = [8, 128], strides = [1, 1]} : vector<8x512xf32> to vector<8x128xf32>
    %cst_41 = arith.constant 5.000000e-01 : f32
    %97 = vector.broadcast %cst_41 : f32 to vector<8x128xf32>
    %98 = arith.mulf %97, %96 : vector<8x128xf32>
    %99 = math.tanh %98 : vector<8x128xf32>
    %cst_42 = arith.constant 5.000000e-01 : f32
    %100 = vector.broadcast %cst_42 : f32 to vector<8x128xf32>
    %101 = arith.mulf %100, %99 : vector<8x128xf32>
    %cst_43 = arith.constant 5.000000e-01 : f32
    %102 = vector.broadcast %cst_43 : f32 to vector<8x128xf32>
    %103 = arith.addf %101, %102 : vector<8x128xf32>
    %104 = vector.extract_strided_slice %95 {offsets = [0, 128], sizes = [8, 128], strides = [1, 1]} : vector<8x512xf32> to vector<8x128xf32>
    %cst_44 = arith.constant 5.000000e-01 : f32
    %105 = vector.broadcast %cst_44 : f32 to vector<8x128xf32>
    %106 = arith.mulf %105, %104 : vector<8x128xf32>
    %107 = math.tanh %106 : vector<8x128xf32>
    %cst_45 = arith.constant 5.000000e-01 : f32
    %108 = vector.broadcast %cst_45 : f32 to vector<8x128xf32>
    %109 = arith.mulf %108, %107 : vector<8x128xf32>
    %cst_46 = arith.constant 5.000000e-01 : f32
    %110 = vector.broadcast %cst_46 : f32 to vector<8x128xf32>
    %111 = arith.addf %109, %110 : vector<8x128xf32>
    %112 = vector.extract_strided_slice %95 {offsets = [0, 256], sizes = [8, 128], strides = [1, 1]} : vector<8x512xf32> to vector<8x128xf32>
    %113 = math.tanh %112 : vector<8x128xf32>
    %114 = vector.extract_strided_slice %95 {offsets = [0, 384], sizes = [8, 128], strides = [1, 1]} : vector<8x512xf32> to vector<8x128xf32>
    %cst_47 = arith.constant 5.000000e-01 : f32
    %115 = vector.broadcast %cst_47 : f32 to vector<8x128xf32>
    %116 = arith.mulf %115, %114 : vector<8x128xf32>
    %117 = math.tanh %116 : vector<8x128xf32>
    %cst_48 = arith.constant 5.000000e-01 : f32
    %118 = vector.broadcast %cst_48 : f32 to vector<8x128xf32>
    %119 = arith.mulf %118, %117 : vector<8x128xf32>
    %cst_49 = arith.constant 5.000000e-01 : f32
    %120 = vector.broadcast %cst_49 : f32 to vector<8x128xf32>
    %121 = arith.addf %119, %120 : vector<8x128xf32>
    %122 = arith.mulf %111, %82 : vector<8x128xf32>
    %123 = arith.mulf %103, %113 : vector<8x128xf32>
    %124 = arith.addf %122, %123 : vector<8x128xf32>
    %125 = math.tanh %124 : vector<8x128xf32>
    %126 = arith.mulf %121, %125 : vector<8x128xf32>
    %127 = arith.index_cast %c2_i32 : i32 to index
    %c0_50 = arith.constant 0 : index
    %c0_51 = arith.constant 0 : index
    %128 = vector.load %arg5[%127, %c0_50, %c0_51] : memref<8x8x128xf32, #tpu.memory_space<vmem>>, vector<1x8x128xf32>
    %129 = vector.shape_cast %128 : vector<1x8x128xf32> to vector<8x128xf32>
    %130 = vector.shape_cast %126 : vector<8x128xf32> to vector<1x8x128xf32>
    tpu.vector_store %arg5[%127, %c0_50, %c0_51], %130 {strides = array<i32>} : memref<8x8x128xf32, #tpu.memory_space<vmem>>, vector<1x8x128xf32>,
    %c3_i32 = arith.constant 3 : i32
    %131 = arith.index_cast %c3_i32 : i32 to index
    %c0_52 = arith.constant 0 : index
    %c0_53 = arith.constant 0 : index
    %132 = vector.load %arg1[%131, %c0_52, %c0_53] : memref<8x8x512xf32, #tpu.memory_space<vmem>>, vector<1x8x512xf32>
    %133 = vector.shape_cast %132 : vector<1x8x512xf32> to vector<8x512xf32>
    %134 = arith.truncf %126 : vector<8x128xf32> to vector<8x128xbf16>
    %c0_54 = arith.constant 0 : index
    %c0_55 = arith.constant 0 : index
    %135 = vector.load %arg2[%c0_54, %c0_55] : memref<128x512xbf16, #tpu.memory_space<vmem>>, vector<128x512xbf16>
    %cst_56 = arith.constant dense<0.000000e+00> : vector<8x512xf32>
    %136 = tpu.matmul %134, %135, %cst_56 {dimension_numbers = #tpu.dot_dimension_numbers<[1], [0], [0], [1], [0, 0, 1, 1], [], []>} : vector<8x128xbf16>, vector<128x512xbf16>, vector<8x512xf32> -> vector<8x512xf32>
    %137 = arith.addf %133, %136 : vector<8x512xf32>
    %138 = vector.extract_strided_slice %137 {offsets = [0, 0], sizes = [8, 128], strides = [1, 1]} : vector<8x512xf32> to vector<8x128xf32>
    %cst_57 = arith.constant 5.000000e-01 : f32
    %139 = vector.broadcast %cst_57 : f32 to vector<8x128xf32>
    %140 = arith.mulf %139, %138 : vector<8x128xf32>
    %141 = math.tanh %140 : vector<8x128xf32>
    %cst_58 = arith.constant 5.000000e-01 : f32
    %142 = vector.broadcast %cst_58 : f32 to vector<8x128xf32>
    %143 = arith.mulf %142, %141 : vector<8x128xf32>
    %cst_59 = arith.constant 5.000000e-01 : f32
    %144 = vector.broadcast %cst_59 : f32 to vector<8x128xf32>
    %145 = arith.addf %143, %144 : vector<8x128xf32>
    %146 = vector.extract_strided_slice %137 {offsets = [0, 128], sizes = [8, 128], strides = [1, 1]} : vector<8x512xf32> to vector<8x128xf32>
    %cst_60 = arith.constant 5.000000e-01 : f32
    %147 = vector.broadcast %cst_60 : f32 to vector<8x128xf32>
    %148 = arith.mulf %147, %146 : vector<8x128xf32>
    %149 = math.tanh %148 : vector<8x128xf32>
    %cst_61 = arith.constant 5.000000e-01 : f32
    %150 = vector.broadcast %cst_61 : f32 to vector<8x128xf32>
    %151 = arith.mulf %150, %149 : vector<8x128xf32>
    %cst_62 = arith.constant 5.000000e-01 : f32
    %152 = vector.broadcast %cst_62 : f32 to vector<8x128xf32>
    %153 = arith.addf %151, %152 : vector<8x128xf32>
    %154 = vector.extract_strided_slice %137 {offsets = [0, 256], sizes = [8, 128], strides = [1, 1]} : vector<8x512xf32> to vector<8x128xf32>
    %155 = math.tanh %154 : vector<8x128xf32>
    %156 = vector.extract_strided_slice %137 {offsets = [0, 384], sizes = [8, 128], strides = [1, 1]} : vector<8x512xf32> to vector<8x128xf32>
    %cst_63 = arith.constant 5.000000e-01 : f32
    %157 = vector.broadcast %cst_63 : f32 to vector<8x128xf32>
    %158 = arith.mulf %157, %156 : vector<8x128xf32>
    %159 = math.tanh %158 : vector<8x128xf32>
    %cst_64 = arith.constant 5.000000e-01 : f32
    %160 = vector.broadcast %cst_64 : f32 to vector<8x128xf32>
    %161 = arith.mulf %160, %159 : vector<8x128xf32>
    %cst_65 = arith.constant 5.000000e-01 : f32
    %162 = vector.broadcast %cst_65 : f32 to vector<8x128xf32>
    %163 = arith.addf %161, %162 : vector<8x128xf32>
    %164 = arith.mulf %153, %124 : vector<8x128xf32>
    %165 = arith.mulf %145, %155 : vector<8x128xf32>
    %166 = arith.addf %164, %165 : vector<8x128xf32>
    %167 = math.tanh %166 : vector<8x128xf32>
    %168 = arith.mulf %163, %167 : vector<8x128xf32>
    %169 = arith.index_cast %c3_i32 : i32 to index
    %c0_66 = arith.constant 0 : index
    %c0_67 = arith.constant 0 : index
    %170 = vector.load %arg5[%169, %c0_66, %c0_67] : memref<8x8x128xf32, #tpu.memory_space<vmem>>, vector<1x8x128xf32>
    %171 = vector.shape_cast %170 : vector<1x8x128xf32> to vector<8x128xf32>
    %172 = vector.shape_cast %168 : vector<8x128xf32> to vector<1x8x128xf32>
    tpu.vector_store %arg5[%169, %c0_66, %c0_67], %172 {strides = array<i32>} : memref<8x8x128xf32, #tpu.memory_space<vmem>>, vector<1x8x128xf32>,
    %c4_i32 = arith.constant 4 : i32
    %173 = arith.index_cast %c4_i32 : i32 to index
    %c0_68 = arith.constant 0 : index
    %c0_69 = arith.constant 0 : index
    %174 = vector.load %arg1[%173, %c0_68, %c0_69] : memref<8x8x512xf32, #tpu.memory_space<vmem>>, vector<1x8x512xf32>
    %175 = vector.shape_cast %174 : vector<1x8x512xf32> to vector<8x512xf32>
    %176 = arith.truncf %168 : vector<8x128xf32> to vector<8x128xbf16>
    %c0_70 = arith.constant 0 : index
    %c0_71 = arith.constant 0 : index
    %177 = vector.load %arg2[%c0_70, %c0_71] : memref<128x512xbf16, #tpu.memory_space<vmem>>, vector<128x512xbf16>
    %cst_72 = arith.constant dense<0.000000e+00> : vector<8x512xf32>
    %178 = tpu.matmul %176, %177, %cst_72 {dimension_numbers = #tpu.dot_dimension_numbers<[1], [0], [0], [1], [0, 0, 1, 1], [], []>} : vector<8x128xbf16>, vector<128x512xbf16>, vector<8x512xf32> -> vector<8x512xf32>
    %179 = arith.addf %175, %178 : vector<8x512xf32>
    %180 = vector.extract_strided_slice %179 {offsets = [0, 0], sizes = [8, 128], strides = [1, 1]} : vector<8x512xf32> to vector<8x128xf32>
    %cst_73 = arith.constant 5.000000e-01 : f32
    %181 = vector.broadcast %cst_73 : f32 to vector<8x128xf32>
    %182 = arith.mulf %181, %180 : vector<8x128xf32>
    %183 = math.tanh %182 : vector<8x128xf32>
    %cst_74 = arith.constant 5.000000e-01 : f32
    %184 = vector.broadcast %cst_74 : f32 to vector<8x128xf32>
    %185 = arith.mulf %184, %183 : vector<8x128xf32>
    %cst_75 = arith.constant 5.000000e-01 : f32
    %186 = vector.broadcast %cst_75 : f32 to vector<8x128xf32>
    %187 = arith.addf %185, %186 : vector<8x128xf32>
    %188 = vector.extract_strided_slice %179 {offsets = [0, 128], sizes = [8, 128], strides = [1, 1]} : vector<8x512xf32> to vector<8x128xf32>
    %cst_76 = arith.constant 5.000000e-01 : f32
    %189 = vector.broadcast %cst_76 : f32 to vector<8x128xf32>
    %190 = arith.mulf %189, %188 : vector<8x128xf32>
    %191 = math.tanh %190 : vector<8x128xf32>
    %cst_77 = arith.constant 5.000000e-01 : f32
    %192 = vector.broadcast %cst_77 : f32 to vector<8x128xf32>
    %193 = arith.mulf %192, %191 : vector<8x128xf32>
    %cst_78 = arith.constant 5.000000e-01 : f32
    %194 = vector.broadcast %cst_78 : f32 to vector<8x128xf32>
    %195 = arith.addf %193, %194 : vector<8x128xf32>
    %196 = vector.extract_strided_slice %179 {offsets = [0, 256], sizes = [8, 128], strides = [1, 1]} : vector<8x512xf32> to vector<8x128xf32>
    %197 = math.tanh %196 : vector<8x128xf32>
    %198 = vector.extract_strided_slice %179 {offsets = [0, 384], sizes = [8, 128], strides = [1, 1]} : vector<8x512xf32> to vector<8x128xf32>
    %cst_79 = arith.constant 5.000000e-01 : f32
    %199 = vector.broadcast %cst_79 : f32 to vector<8x128xf32>
    %200 = arith.mulf %199, %198 : vector<8x128xf32>
    %201 = math.tanh %200 : vector<8x128xf32>
    %cst_80 = arith.constant 5.000000e-01 : f32
    %202 = vector.broadcast %cst_80 : f32 to vector<8x128xf32>
    %203 = arith.mulf %202, %201 : vector<8x128xf32>
    %cst_81 = arith.constant 5.000000e-01 : f32
    %204 = vector.broadcast %cst_81 : f32 to vector<8x128xf32>
    %205 = arith.addf %203, %204 : vector<8x128xf32>
    %206 = arith.mulf %195, %166 : vector<8x128xf32>
    %207 = arith.mulf %187, %197 : vector<8x128xf32>
    %208 = arith.addf %206, %207 : vector<8x128xf32>
    %209 = math.tanh %208 : vector<8x128xf32>
    %210 = arith.mulf %205, %209 : vector<8x128xf32>
    %211 = arith.index_cast %c4_i32 : i32 to index
    %c0_82 = arith.constant 0 : index
    %c0_83 = arith.constant 0 : index
    %212 = vector.load %arg5[%211, %c0_82, %c0_83] : memref<8x8x128xf32, #tpu.memory_space<vmem>>, vector<1x8x128xf32>
    %213 = vector.shape_cast %212 : vector<1x8x128xf32> to vector<8x128xf32>
    %214 = vector.shape_cast %210 : vector<8x128xf32> to vector<1x8x128xf32>
    tpu.vector_store %arg5[%211, %c0_82, %c0_83], %214 {strides = array<i32>} : memref<8x8x128xf32, #tpu.memory_space<vmem>>, vector<1x8x128xf32>,
    %c5_i32 = arith.constant 5 : i32
    %215 = arith.index_cast %c5_i32 : i32 to index
    %c0_84 = arith.constant 0 : index
    %c0_85 = arith.constant 0 : index
    %216 = vector.load %arg1[%215, %c0_84, %c0_85] : memref<8x8x512xf32, #tpu.memory_space<vmem>>, vector<1x8x512xf32>
    %217 = vector.shape_cast %216 : vector<1x8x512xf32> to vector<8x512xf32>
    %218 = arith.truncf %210 : vector<8x128xf32> to vector<8x128xbf16>
    %c0_86 = arith.constant 0 : index
    %c0_87 = arith.constant 0 : index
    %219 = vector.load %arg2[%c0_86, %c0_87] : memref<128x512xbf16, #tpu.memory_space<vmem>>, vector<128x512xbf16>
    %cst_88 = arith.constant dense<0.000000e+00> : vector<8x512xf32>
    %220 = tpu.matmul %218, %219, %cst_88 {dimension_numbers = #tpu.dot_dimension_numbers<[1], [0], [0], [1], [0, 0, 1, 1], [], []>} : vector<8x128xbf16>, vector<128x512xbf16>, vector<8x512xf32> -> vector<8x512xf32>
    %221 = arith.addf %217, %220 : vector<8x512xf32>
    %222 = vector.extract_strided_slice %221 {offsets = [0, 0], sizes = [8, 128], strides = [1, 1]} : vector<8x512xf32> to vector<8x128xf32>
    %cst_89 = arith.constant 5.000000e-01 : f32
    %223 = vector.broadcast %cst_89 : f32 to vector<8x128xf32>
    %224 = arith.mulf %223, %222 : vector<8x128xf32>
    %225 = math.tanh %224 : vector<8x128xf32>
    %cst_90 = arith.constant 5.000000e-01 : f32
    %226 = vector.broadcast %cst_90 : f32 to vector<8x128xf32>
    %227 = arith.mulf %226, %225 : vector<8x128xf32>
    %cst_91 = arith.constant 5.000000e-01 : f32
    %228 = vector.broadcast %cst_91 : f32 to vector<8x128xf32>
    %229 = arith.addf %227, %228 : vector<8x128xf32>
    %230 = vector.extract_strided_slice %221 {offsets = [0, 128], sizes = [8, 128], strides = [1, 1]} : vector<8x512xf32> to vector<8x128xf32>
    %cst_92 = arith.constant 5.000000e-01 : f32
    %231 = vector.broadcast %cst_92 : f32 to vector<8x128xf32>
    %232 = arith.mulf %231, %230 : vector<8x128xf32>
    %233 = math.tanh %232 : vector<8x128xf32>
    %cst_93 = arith.constant 5.000000e-01 : f32
    %234 = vector.broadcast %cst_93 : f32 to vector<8x128xf32>
    %235 = arith.mulf %234, %233 : vector<8x128xf32>
    %cst_94 = arith.constant 5.000000e-01 : f32
    %236 = vector.broadcast %cst_94 : f32 to vector<8x128xf32>
    %237 = arith.addf %235, %236 : vector<8x128xf32>
    %238 = vector.extract_strided_slice %221 {offsets = [0, 256], sizes = [8, 128], strides = [1, 1]} : vector<8x512xf32> to vector<8x128xf32>
    %239 = math.tanh %238 : vector<8x128xf32>
    %240 = vector.extract_strided_slice %221 {offsets = [0, 384], sizes = [8, 128], strides = [1, 1]} : vector<8x512xf32> to vector<8x128xf32>
    %cst_95 = arith.constant 5.000000e-01 : f32
    %241 = vector.broadcast %cst_95 : f32 to vector<8x128xf32>
    %242 = arith.mulf %241, %240 : vector<8x128xf32>
    %243 = math.tanh %242 : vector<8x128xf32>
    %cst_96 = arith.constant 5.000000e-01 : f32
    %244 = vector.broadcast %cst_96 : f32 to vector<8x128xf32>
    %245 = arith.mulf %244, %243 : vector<8x128xf32>
    %cst_97 = arith.constant 5.000000e-01 : f32
    %246 = vector.broadcast %cst_97 : f32 to vector<8x128xf32>
    %247 = arith.addf %245, %246 : vector<8x128xf32>
    %248 = arith.mulf %237, %208 : vector<8x128xf32>
    %249 = arith.mulf %229, %239 : vector<8x128xf32>
    %250 = arith.addf %248, %249 : vector<8x128xf32>
    %251 = math.tanh %250 : vector<8x128xf32>
    %252 = arith.mulf %247, %251 : vector<8x128xf32>
    %253 = arith.index_cast %c5_i32 : i32 to index
    %c0_98 = arith.constant 0 : index
    %c0_99 = arith.constant 0 : index
    %254 = vector.load %arg5[%253, %c0_98, %c0_99] : memref<8x8x128xf32, #tpu.memory_space<vmem>>, vector<1x8x128xf32>
    %255 = vector.shape_cast %254 : vector<1x8x128xf32> to vector<8x128xf32>
    %256 = vector.shape_cast %252 : vector<8x128xf32> to vector<1x8x128xf32>
    tpu.vector_store %arg5[%253, %c0_98, %c0_99], %256 {strides = array<i32>} : memref<8x8x128xf32, #tpu.memory_space<vmem>>, vector<1x8x128xf32>,
    %c6_i32 = arith.constant 6 : i32
    %257 = arith.index_cast %c6_i32 : i32 to index
    %c0_100 = arith.constant 0 : index
    %c0_101 = arith.constant 0 : index
    %258 = vector.load %arg1[%257, %c0_100, %c0_101] : memref<8x8x512xf32, #tpu.memory_space<vmem>>, vector<1x8x512xf32>
    %259 = vector.shape_cast %258 : vector<1x8x512xf32> to vector<8x512xf32>
    %260 = arith.truncf %252 : vector<8x128xf32> to vector<8x128xbf16>
    %c0_102 = arith.constant 0 : index
    %c0_103 = arith.constant 0 : index
    %261 = vector.load %arg2[%c0_102, %c0_103] : memref<128x512xbf16, #tpu.memory_space<vmem>>, vector<128x512xbf16>
    %cst_104 = arith.constant dense<0.000000e+00> : vector<8x512xf32>
    %262 = tpu.matmul %260, %261, %cst_104 {dimension_numbers = #tpu.dot_dimension_numbers<[1], [0], [0], [1], [0, 0, 1, 1], [], []>} : vector<8x128xbf16>, vector<128x512xbf16>, vector<8x512xf32> -> vector<8x512xf32>
    %263 = arith.addf %259, %262 : vector<8x512xf32>
    %264 = vector.extract_strided_slice %263 {offsets = [0, 0], sizes = [8, 128], strides = [1, 1]} : vector<8x512xf32> to vector<8x128xf32>
    %cst_105 = arith.constant 5.000000e-01 : f32
    %265 = vector.broadcast %cst_105 : f32 to vector<8x128xf32>
    %266 = arith.mulf %265, %264 : vector<8x128xf32>
    %267 = math.tanh %266 : vector<8x128xf32>
    %cst_106 = arith.constant 5.000000e-01 : f32
    %268 = vector.broadcast %cst_106 : f32 to vector<8x128xf32>
    %269 = arith.mulf %268, %267 : vector<8x128xf32>
    %cst_107 = arith.constant 5.000000e-01 : f32
    %270 = vector.broadcast %cst_107 : f32 to vector<8x128xf32>
    %271 = arith.addf %269, %270 : vector<8x128xf32>
    %272 = vector.extract_strided_slice %263 {offsets = [0, 128], sizes = [8, 128], strides = [1, 1]} : vector<8x512xf32> to vector<8x128xf32>
    %cst_108 = arith.constant 5.000000e-01 : f32
    %273 = vector.broadcast %cst_108 : f32 to vector<8x128xf32>
    %274 = arith.mulf %273, %272 : vector<8x128xf32>
    %275 = math.tanh %274 : vector<8x128xf32>
    %cst_109 = arith.constant 5.000000e-01 : f32
    %276 = vector.broadcast %cst_109 : f32 to vector<8x128xf32>
    %277 = arith.mulf %276, %275 : vector<8x128xf32>
    %cst_110 = arith.constant 5.000000e-01 : f32
    %278 = vector.broadcast %cst_110 : f32 to vector<8x128xf32>
    %279 = arith.addf %277, %278 : vector<8x128xf32>
    %280 = vector.extract_strided_slice %263 {offsets = [0, 256], sizes = [8, 128], strides = [1, 1]} : vector<8x512xf32> to vector<8x128xf32>
    %281 = math.tanh %280 : vector<8x128xf32>
    %282 = vector.extract_strided_slice %263 {offsets = [0, 384], sizes = [8, 128], strides = [1, 1]} : vector<8x512xf32> to vector<8x128xf32>
    %cst_111 = arith.constant 5.000000e-01 : f32
    %283 = vector.broadcast %cst_111 : f32 to vector<8x128xf32>
    %284 = arith.mulf %283, %282 : vector<8x128xf32>
    %285 = math.tanh %284 : vector<8x128xf32>
    %cst_112 = arith.constant 5.000000e-01 : f32
    %286 = vector.broadcast %cst_112 : f32 to vector<8x128xf32>
    %287 = arith.mulf %286, %285 : vector<8x128xf32>
    %cst_113 = arith.constant 5.000000e-01 : f32
    %288 = vector.broadcast %cst_113 : f32 to vector<8x128xf32>
    %289 = arith.addf %287, %288 : vector<8x128xf32>
    %290 = arith.mulf %279, %250 : vector<8x128xf32>
    %291 = arith.mulf %271, %281 : vector<8x128xf32>
    %292 = arith.addf %290, %291 : vector<8x128xf32>
    %293 = math.tanh %292 : vector<8x128xf32>
    %294 = arith.mulf %289, %293 : vector<8x128xf32>
    %295 = arith.index_cast %c6_i32 : i32 to index
    %c0_114 = arith.constant 0 : index
    %c0_115 = arith.constant 0 : index
    %296 = vector.load %arg5[%295, %c0_114, %c0_115] : memref<8x8x128xf32, #tpu.memory_space<vmem>>, vector<1x8x128xf32>
    %297 = vector.shape_cast %296 : vector<1x8x128xf32> to vector<8x128xf32>
    %298 = vector.shape_cast %294 : vector<8x128xf32> to vector<1x8x128xf32>
    tpu.vector_store %arg5[%295, %c0_114, %c0_115], %298 {strides = array<i32>} : memref<8x8x128xf32, #tpu.memory_space<vmem>>, vector<1x8x128xf32>,
    %c7_i32 = arith.constant 7 : i32
    %299 = arith.index_cast %c7_i32 : i32 to index
    %c0_116 = arith.constant 0 : index
    %c0_117 = arith.constant 0 : index
    %300 = vector.load %arg1[%299, %c0_116, %c0_117] : memref<8x8x512xf32, #tpu.memory_space<vmem>>, vector<1x8x512xf32>
    %301 = vector.shape_cast %300 : vector<1x8x512xf32> to vector<8x512xf32>
    %302 = arith.truncf %294 : vector<8x128xf32> to vector<8x128xbf16>
    %c0_118 = arith.constant 0 : index
    %c0_119 = arith.constant 0 : index
    %303 = vector.load %arg2[%c0_118, %c0_119] : memref<128x512xbf16, #tpu.memory_space<vmem>>, vector<128x512xbf16>
    %cst_120 = arith.constant dense<0.000000e+00> : vector<8x512xf32>
    %304 = tpu.matmul %302, %303, %cst_120 {dimension_numbers = #tpu.dot_dimension_numbers<[1], [0], [0], [1], [0, 0, 1, 1], [], []>} : vector<8x128xbf16>, vector<128x512xbf16>, vector<8x512xf32> -> vector<8x512xf32>
    %305 = arith.addf %301, %304 : vector<8x512xf32>
    %306 = vector.extract_strided_slice %305 {offsets = [0, 0], sizes = [8, 128], strides = [1, 1]} : vector<8x512xf32> to vector<8x128xf32>
    %cst_121 = arith.constant 5.000000e-01 : f32
    %307 = vector.broadcast %cst_121 : f32 to vector<8x128xf32>
    %308 = arith.mulf %307, %306 : vector<8x128xf32>
    %309 = math.tanh %308 : vector<8x128xf32>
    %cst_122 = arith.constant 5.000000e-01 : f32
    %310 = vector.broadcast %cst_122 : f32 to vector<8x128xf32>
    %311 = arith.mulf %310, %309 : vector<8x128xf32>
    %cst_123 = arith.constant 5.000000e-01 : f32
    %312 = vector.broadcast %cst_123 : f32 to vector<8x128xf32>
    %313 = arith.addf %311, %312 : vector<8x128xf32>
    %314 = vector.extract_strided_slice %305 {offsets = [0, 128], sizes = [8, 128], strides = [1, 1]} : vector<8x512xf32> to vector<8x128xf32>
    %cst_124 = arith.constant 5.000000e-01 : f32
    %315 = vector.broadcast %cst_124 : f32 to vector<8x128xf32>
    %316 = arith.mulf %315, %314 : vector<8x128xf32>
    %317 = math.tanh %316 : vector<8x128xf32>
    %cst_125 = arith.constant 5.000000e-01 : f32
    %318 = vector.broadcast %cst_125 : f32 to vector<8x128xf32>
    %319 = arith.mulf %318, %317 : vector<8x128xf32>
    %cst_126 = arith.constant 5.000000e-01 : f32
    %320 = vector.broadcast %cst_126 : f32 to vector<8x128xf32>
    %321 = arith.addf %319, %320 : vector<8x128xf32>
    %322 = vector.extract_strided_slice %305 {offsets = [0, 256], sizes = [8, 128], strides = [1, 1]} : vector<8x512xf32> to vector<8x128xf32>
    %323 = math.tanh %322 : vector<8x128xf32>
    %324 = vector.extract_strided_slice %305 {offsets = [0, 384], sizes = [8, 128], strides = [1, 1]} : vector<8x512xf32> to vector<8x128xf32>
    %cst_127 = arith.constant 5.000000e-01 : f32
    %325 = vector.broadcast %cst_127 : f32 to vector<8x128xf32>
    %326 = arith.mulf %325, %324 : vector<8x128xf32>
    %327 = math.tanh %326 : vector<8x128xf32>
    %cst_128 = arith.constant 5.000000e-01 : f32
    %328 = vector.broadcast %cst_128 : f32 to vector<8x128xf32>
    %329 = arith.mulf %328, %327 : vector<8x128xf32>
    %cst_129 = arith.constant 5.000000e-01 : f32
    %330 = vector.broadcast %cst_129 : f32 to vector<8x128xf32>
    %331 = arith.addf %329, %330 : vector<8x128xf32>
    %332 = arith.mulf %321, %292 : vector<8x128xf32>
    %333 = arith.mulf %313, %323 : vector<8x128xf32>
    %334 = arith.addf %332, %333 : vector<8x128xf32>
    %335 = math.tanh %334 : vector<8x128xf32>
    %336 = arith.mulf %331, %335 : vector<8x128xf32>
    %337 = arith.index_cast %c7_i32 : i32 to index
    %c0_130 = arith.constant 0 : index
    %c0_131 = arith.constant 0 : index
    %338 = vector.load %arg5[%337, %c0_130, %c0_131] : memref<8x8x128xf32, #tpu.memory_space<vmem>>, vector<1x8x128xf32>
    %339 = vector.shape_cast %338 : vector<1x8x128xf32> to vector<8x128xf32>
    %340 = vector.shape_cast %336 : vector<8x128xf32> to vector<1x8x128xf32>
    tpu.vector_store %arg5[%337, %c0_130, %c0_131], %340 {strides = array<i32>} : memref<8x8x128xf32, #tpu.memory_space<vmem>>, vector<1x8x128xf32>,
    %c8_i32 = arith.constant 8 : i32
    %c0_132 = arith.constant 0 : index
    %c0_133 = arith.constant 0 : index
    %341 = vector.load %arg7[%c0_132, %c0_133] : memref<8x128xf32, #tpu.memory_space<vmem>>, vector<8x128xf32>
    tpu.vector_store %arg7[%c0_132, %c0_133], %336 {strides = array<i32>} : memref<8x128xf32, #tpu.memory_space<vmem>>, vector<8x128xf32>,
    %c0_134 = arith.constant 0 : index
    %c0_135 = arith.constant 0 : index
    %342 = vector.load %arg6[%c0_134, %c0_135] : memref<8x128xf32, #tpu.memory_space<vmem>>, vector<8x128xf32>
    tpu.vector_store %arg6[%c0_134, %c0_135], %334 {strides = array<i32>} : memref<8x128xf32, #tpu.memory_space<vmem>>, vector<8x128xf32>,
    return
  }
  func.func @transform_0(%arg0: i32) -> (i32, i32, i32) {
    %c0_i32 = arith.constant 0 : i32
    %c0_i32_0 = arith.constant 0 : i32
    %c0_i32_1 = arith.constant 0 : i32
    return %arg0, %c0_i32, %c0_i32_0 : i32, i32, i32
  }
  func.func @transform_1(%arg0: i32) -> (i32, i32) {
    %c0_i32 = arith.constant 0 : i32
    %c0_i32_0 = arith.constant 0 : i32
    %c0_i32_1 = arith.constant 0 : i32
    return %c0_i32, %c0_i32_0 : i32, i32
  }
  func.func @transform_2(%arg0: i32) -> (i32, i32) {
    %c0_i32 = arith.constant 0 : i32
    %c0_i32_0 = arith.constant 0 : i32
    %c0_i32_1 = arith.constant 0 : i32
    return %c0_i32, %c0_i32_0 : i32, i32
  }
  func.func @transform_3(%arg0: i32) -> (i32, i32) {
    %c0_i32 = arith.constant 0 : i32
    %c0_i32_0 = arith.constant 0 : i32
    %c0_i32_1 = arith.constant 0 : i32
    return %c0_i32, %c0_i32_0 : i32, i32
  }
  func.func @transform_4(%arg0: i32) -> (i32, i32, i32) {
    %c0_i32 = arith.constant 0 : i32
    %c0_i32_0 = arith.constant 0 : i32
    %c0_i32_1 = arith.constant 0 : i32
    return %arg0, %c0_i32, %c0_i32_0 : i32, i32, i32
  }
  func.func @transform_5(%arg0: i32) -> (i32, i32) {
    %c0_i32 = arith.constant 0 : i32
    %c0_i32_0 = arith.constant 0 : i32
    %c0_i32_1 = arith.constant 0 : i32
    return %c0_i32, %c0_i32_0 : i32, i32
  }
}

</mosaic_0001>

<bundles_post_ra>
// kernel: _controller_rollout.1
= control target key start
LH: loop header
LB: loop body
LE: loop exit
PB: predicated region body
PF: predicated region fallthrough
CT: control target
= control target key end

     0   :  { %v2938_v1 = vmov 0   ;;  %s3714_s1 = inlined_call_operand.vmem [shape: bf16[128,512], index: 1, kind: input, shape index: {}]   ;;  %s3715_s2 = inlined_call_operand.vmem [shape: f32[8,128], index: 2, kind: input, shape index: {}]   ;;  %s3716_s0 = inlined_call_operand.vmem [shape: f32[8,8,512], index: 0, kind: input, shape index: {}]   ;;  %s3717_s3 = inlined_call_operand.vmem [shape: f32[8,128], index: 3, kind: input, shape index: {}]   ;;  %s3718_s4 = inlined_call_operand.vmem [shape: f32[8,8,128], index: 4, kind: output, shape index: {0}]   ;;  %s3719_s5 = inlined_call_operand.vmem [shape: f32[8,128], index: 5, kind: output, shape index: {1}]  }
   0x1   :  { %v2972_v0 = vld [vmem:[%s3714_s1 + $0xe4] ss:$16 sps:$4 sm:$0xff]   ;;  %259 = vmatprep.mubr.bf16.mxu0 %v2938_v1  ;;  %300 = vmatprep.mubr.bf16.mxu1 %v2938_v1  ;;  %v2979_v2 = vld [vmem:[%s3714_s1 + $0xe0] ss:$16 sps:$4 sm:$0xff]   ;;  %v2985_v3 = vld [vmem:[%s3714_s1 + $0xec] ss:$16 sps:$4 sm:$0xff]  }
   0x2   :  { %227 = vmatprep.subr.bf16.mxu0 %v2972_v0  ;;  %v2990_v4 = vld [vmem:[%s3714_s1 + $0xe8] ss:$16 sps:$4 sm:$0xff]   ;;  %v2996_v5 = vld [vmem:[%s3714_s1 + $0xc4] ss:$16 sps:$4 sm:$0xff]   ;;  %v3001_v6 = vld [vmem:[%s3714_s1 + $0xc0] ss:$16 sps:$4 sm:$0xff]   ;;  %268 = vmatprep.subr.bf16.mxu1 %v2985_v3 }
   0x3   :  { %228 = vmatpush1.bf16.msra.mxu0 %v2979_v2  ;;  %v3007_v7 = vld [vmem:[%s3714_s1 + $0xcc] ss:$16 sps:$4 sm:$0xff]   ;;  %269 = vmatpush1.bf16.msra.mxu1 %v2990_v4  ;;  %v3014_v8 = vld [vmem:[%s3714_s1 + $0xc8] ss:$16 sps:$4 sm:$0xff]   ;;  %v3020_v9 = vld [vmem:[%s3714_s1 + $0xa4] ss:$16 sps:$4 sm:$0xff]  }
   0x4   :  { %229 = vmatprep.subr.bf16.mxu0 %v2996_v5  ;;  %270 = vmatprep.subr.bf16.mxu1 %v3007_v7  ;;  %v3026_v10 = vld [vmem:[%s3714_s1 + $0xa0] ss:$16 sps:$4 sm:$0xff]   ;;  %v3031_v11 = vld [vmem:[%s3714_s1 + $0xac] ss:$16 sps:$4 sm:$0xff]   ;;  %v3037_v12 = vld [vmem:[%s3714_s1 + $0x84] ss:$16 sps:$4 sm:$0xff]  }
   0x5   :  { %v3043_v13 = vld [vmem:[%s3714_s1 + $0xa8] ss:$16 sps:$4 sm:$0xff]   ;;  %v3049_v14 = vld [vmem:[%s3714_s1 + $0x8c] ss:$16 sps:$4 sm:$0xff]   ;;  %v3055_v15 = vld [vmem:[%s3714_s1 + $0x80] ss:$16 sps:$4 sm:$0xff]  }
   0x6   :  { %v3061_v16 = vld [vmem:[%s3714_s1 + $0x64] ss:$16 sps:$4 sm:$0xff]   ;;  %v3067_v17 = vld [vmem:[%s3714_s1 + $0x88] ss:$16 sps:$4 sm:$0xff]   ;;  %v3073_v18 = vld [vmem:[%s3714_s1 + $0x6c] ss:$16 sps:$4 sm:$0xff]  }
   0x7   :  { %230 = vmatpush1.bf16.msra.mxu0 %v3001_v6  ;;  %271 = vmatpush1.bf16.msra.mxu1 %v3014_v8  ;;  %v3079_v19 = vld [vmem:[%s3714_s1 + $0x60] ss:$16 sps:$4 sm:$0xff]   ;;  %v3085_v20 = vld [vmem:[%s3714_s1 + $0x44] ss:$16 sps:$4 sm:$0xff]   ;;  %v3091_v21 = vld [vmem:[%s3714_s1 + $0x68] ss:$16 sps:$4 sm:$0xff]  }
   0x8   :  { %231 = vmatprep.subr.bf16.mxu0 %v3020_v9  ;;  %272 = vmatprep.subr.bf16.mxu1 %v3031_v11  ;;  %v3097_v22 = vld [vmem:[%s3714_s1 + $0x4c] ss:$16 sps:$4 sm:$0xff]   ;;  %v3103_v23 = vld [vmem:[%s3714_s1 + $0x40] ss:$16 sps:$4 sm:$0xff]   ;;  %v3109_v24 = vld [vmem:[%s3714_s1 + $0x24] ss:$16 sps:$4 sm:$0xff]  }
   0x9   :  { %v3115_v25 = vld [vmem:[%s3714_s1 + $0x48] ss:$16 sps:$4 sm:$0xff]   ;;  %v3120_v26 = vld [vmem:[%s3714_s1 + $0x20] ss:$16 sps:$4 sm:$0xff]   ;;  %v3125_v27 = vld [vmem:[%s3714_s1 + $0x2c] ss:$16 sps:$4 sm:$0xff]  }
   0xa   :  { %v3131_v28 = vld [vmem:[%s3714_s1 + $0x4] ss:$16 sps:$4 sm:$0xff]   ;;  %v3137_v29 = vld [vmem:[%s3714_s1 + $0x28] ss:$16 sps:$4 sm:$0xff]   ;;  %v3143_v30 = vld [vmem:[%s3714_s1 + $0xc] ss:$16 sps:$4 sm:$0xff]  }
   0xb   :  { %232 = vmatpush1.bf16.msra.mxu0 %v3026_v10  ;;  %273 = vmatpush1.bf16.msra.mxu1 %v3043_v13  ;;  %v3149_v31 = vld [vmem:[%s3714_s1] ss:$16 sps:$4 sm:$0xff]   ;;  %v3159_v33 = vld [vmem:[%s3714_s1 + $0x8] ss:$16 sps:$4 sm:$0xff]  }
   0xc   :  { %233 = vmatprep.subr.bf16.mxu0 %v3037_v12  ;;  %274 = vmatprep.subr.bf16.mxu1 %v3049_v14  ;;  %v24_v32 = vld [vmem:[%s3715_s2] sm:$0xff]  ;;  %v31_v37 = vld [vmem:[%s3716_s0 + $0x8] sm:$0xff]  ;;  %v32_v40 = vld [vmem:[%s3716_s0 + $0x10] sm:$0xff] }
   0xd   :  { %v34_v34 = vpack.c.bf16 %v24_v32, %v24_v32  ;;  %v30_v35 = vld [vmem:[%s3716_s0] sm:$0xff]  ;;  %v33_v51 = vld [vmem:[%s3716_s0 + $0x18] sm:$0xff] }
   0xe   :  { %v26_v60 = vld [vmem:[%s3717_s3] sm:$0xff] }
   0xf   :  { %234 = vmatpush1.bf16.msra.mxu0 %v3055_v15  ;;  %275 = vmatpush1.bf16.msra.mxu1 %v3067_v17 }
  0x10   :  { %235 = vmatprep.subr.bf16.mxu0 %v3061_v16  ;;  %276 = vmatprep.subr.bf16.mxu1 %v3073_v18 }
  0x13   :  { %236 = vmatpush1.bf16.msra.mxu0 %v3079_v19  ;;  %277 = vmatpush1.bf16.msra.mxu1 %v3091_v21 }
  0x14   :  { %237 = vmatprep.subr.bf16.mxu0 %v3085_v20  ;;  %278 = vmatprep.subr.bf16.mxu1 %v3097_v22 }
  0x17   :  { %238 = vmatpush1.bf16.msra.mxu0 %v3103_v23  ;;  %279 = vmatpush1.bf16.msra.mxu1 %v3115_v25 }
  0x18   :  { %239 = vmatprep.subr.bf16.mxu0 %v3109_v24  ;;  %280 = vmatprep.subr.bf16.mxu1 %v3125_v27 }
  0x1b   :  { %240 = vmatpush1.bf16.msra.mxu0 %v3120_v26  ;;  %281 = vmatpush1.bf16.msra.mxu1 %v3137_v29 }
  0x1c   :  { %241 = vmatprep.subr.bf16.mxu0 %v3131_v28  ;;  %282 = vmatprep.subr.bf16.mxu1 %v3143_v30 }
  0x1f   :  { %242 = vmatpush1.bf16.msra.mxu0 %v3149_v31  ;;  %283 = vmatpush1.bf16.msra.mxu1 %v3159_v33 }
  0x20   :  { %530 = vmatprep.subr.bf16.mxu0 %v2972_v0  ;;  %571 = vmatprep.subr.bf16.mxu1 %v2985_v3 }
  0x22   :  { %260 = vmatmul.mubr.bf16.vlgmr.msra.gmra.mxu0 %v34_v34  ;;  %301 = vmatmul.mubr.bf16.vlgmr.msra.gmra.mxu1 %v34_v34 }
  0x23   :  { %531 = vmatpush1.bf16.msra.mxu0 %v2979_v2  ;;  %562 = vmatprep.mubr.bf16.mxu0 %v2938_v1 }
  0x24   :  { %532 = vmatprep.subr.bf16.mxu0 %v2996_v5  ;;  %572 = vmatpush1.bf16.msra.mxu1 %v2990_v4 }
  0x25   :  { %603 = vmatprep.mubr.bf16.mxu1 %v2938_v1  ;;  %573 = vmatprep.subr.bf16.mxu1 %v3007_v7 }
  0x27   :  { %533 = vmatpush1.bf16.msra.mxu0 %v3001_v6 }
  0x28   :  { %534 = vmatprep.subr.bf16.mxu0 %v3020_v9  ;;  %574 = vmatpush1.bf16.msra.mxu1 %v3014_v8 }
  0x29   :  { %575 = vmatprep.subr.bf16.mxu1 %v3031_v11 }
  0x2b   :  { %535 = vmatpush1.bf16.msra.mxu0 %v3026_v10 }
  0x2c   :  { %536 = vmatprep.subr.bf16.mxu0 %v3037_v12  ;;  %576 = vmatpush1.bf16.msra.mxu1 %v3043_v13 }
  0x2d   :  { %577 = vmatprep.subr.bf16.mxu1 %v3049_v14 }
  0x2f   :  { %537 = vmatpush1.bf16.msra.mxu0 %v3055_v15 }
  0x30   :  { %538 = vmatprep.subr.bf16.mxu0 %v3061_v16  ;;  %578 = vmatpush1.bf16.msra.mxu1 %v3067_v17 }
  0x31   :  { %579 = vmatprep.subr.bf16.mxu1 %v3073_v18 }
  0x33   :  { %539 = vmatpush1.bf16.msra.mxu0 %v3079_v19 }
  0x34   :  { %540 = vmatprep.subr.bf16.mxu0 %v3085_v20  ;;  %580 = vmatpush1.bf16.msra.mxu1 %v3091_v21 }
  0x35   :  { %581 = vmatprep.subr.bf16.mxu1 %v3097_v22 }
  0x37   :  { %541 = vmatpush1.bf16.msra.mxu0 %v3103_v23 }
  0x38   :  { %542 = vmatprep.subr.bf16.mxu0 %v3109_v24  ;;  %582 = vmatpush1.bf16.msra.mxu1 %v3115_v25 }
  0x39   :  { %583 = vmatprep.subr.bf16.mxu1 %v3125_v27 }
  0x3b   :  { %543 = vmatpush1.bf16.msra.mxu0 %v3120_v26 }
  0x3c   :  { %544 = vmatprep.subr.bf16.mxu0 %v3131_v28  ;;  %584 = vmatpush1.bf16.msra.mxu1 %v3137_v29 }
  0x3d   :  { %585 = vmatprep.subr.bf16.mxu1 %v3143_v30 }
  0x3f   :  { %545 = vmatpush1.bf16.msra.mxu0 %v3149_v31 }
  0x40   :  { %834 = vmatprep.subr.bf16.mxu0 %v2972_v0  ;;  %586 = vmatpush1.bf16.msra.mxu1 %v3159_v33 }
  0x41   :  { %875 = vmatprep.subr.bf16.mxu1 %v2985_v3 }
  0xe2   :  { %v261_v36 = vpop.f32.mrf.mxu0  ;;  %v302_v41 = vpop.f32.mrf.mxu1 }
  0xe3   :  { %v309_v38 = vadd.f32 %v261_v36, %v30_v35  ;;  %v311_v47 = vadd.f32 %v302_v41, %v32_v40  ;;  %v2502_v40 = vld [vmem:[%s3716_s0 + $0x20] sm:$0xff] }
  0xe4   :  { %v263_v39 = vpop.f32.mrf.mxu0  ;;  %v304_v45 = vpop.f32.mrf.mxu1 }
  0xe5   :  { %v313_v42 = vmul.f32 0.5, %v309_v38  ;;  %v310_v43 = vadd.f32 %v263_v39, %v31_v37  ;;  %v312_v52 = vadd.f32 %v304_v45, %v33_v51 }
  0xe6   :  { %v265_v44 = vpop.f32.mrf.mxu0  ;;  %v306_v49 = vpop.f32.mrf.mxu1 }
  0xe7   :  { %2858 = vtanh.f32 %v313_v42  ;;  %v317_v46 = vmul.f32 0.5, %v310_v43  ;;  %v322_v53 = vmul.f32 0.5, %v312_v52  ;;  %v2503_v43 = vld [vmem:[%s3716_s0 + $0x28] sm:$0xff] }
  0xe8   :  { %v266_v48 = vpop.f32.mrf.mxu0  ;;  %v307_v50 = vpop.f32.mrf.mxu1 }
  0xe9   :  { %2860 = vtanh.f32 %v317_v46 }
  0xea   :  { %2862 = vtanh.f32 %v311_v47 }
  0xeb   :  { %2864 = vtanh.f32 %v322_v53 }
  0xf4   :  { %v2859_v54 = vpop.eup %2858 }
  0xf5   :  { %v315_v55 = vmul.f32 0.5, %v2859_v54  ;;  %v2505_v54 = vld [vmem:[%s3716_s0 + $0x38] sm:$0xff] }
  0xf6   :  { %v2861_v56 = vpop.eup %2860 }
  0xf7   :  { %v316_v57 = vadd.f32 0.5, %v315_v55  ;;  %v319_v58 = vmul.f32 0.5, %v2861_v56  ;;  %v2863_v59 = vpop.eup %2862 }
  0xf8   :  { %v2865_v34 = vpop.eup %2864 }
  0xf9   :  { %v320_v61 = vadd.f32 0.5, %v319_v58  ;;  %v327_v63 = vmul.f32 %v2863_v59, %v316_v57  ;;  %v324_v35 = vmul.f32 0.5, %v2865_v34 }
  0xfb   :  { %v326_v62 = vmul.f32 %v320_v61, %v26_v60  ;;  %v325_v36 = vadd.f32 0.5, %v324_v35 }
  0xfd   :  { %v3217_v32 = vadd.f32 %v327_v63, %v326_v62 }
  0xff   :  { %2866 = vtanh.f32 %v3217_v32 }
 0x10c   :  { %v2867_v37 = vpop.eup %2866 }
 0x10d   :  { %v330_v38 = vmul.f32 %v2867_v37, %v325_v36 }
 0x10f   :  { %331 = vst [vmem:[%s3718_s4] sm:$0xff] %v330_v38  ;;  %v337_v39 = vpack.c.bf16 %v330_v38, %v330_v38 }
 0x111   :  { %563 = vmatmul.mubr.bf16.vlgmr.msra.gmra.mxu0 %v337_v39  ;;  %604 = vmatmul.mubr.bf16.vlgmr.msra.gmra.mxu1 %v337_v39 }
 0x112   :  { %835 = vmatpush1.bf16.msra.mxu0 %v2979_v2  ;;  %876 = vmatpush1.bf16.msra.mxu1 %v2990_v4 }
 0x113   :  { %836 = vmatprep.subr.bf16.mxu0 %v2996_v5  ;;  %877 = vmatprep.subr.bf16.mxu1 %v3007_v7 }
 0x114   :  { %866 = vmatprep.mubr.bf16.mxu0 %v2938_v1  ;;  %907 = vmatprep.mubr.bf16.mxu1 %v2938_v1 }
 0x116   :  { %837 = vmatpush1.bf16.msra.mxu0 %v3001_v6  ;;  %878 = vmatpush1.bf16.msra.mxu1 %v3014_v8 }
 0x117   :  { %838 = vmatprep.subr.bf16.mxu0 %v3020_v9  ;;  %879 = vmatprep.subr.bf16.mxu1 %v3031_v11 }
 0x11a   :  { %839 = vmatpush1.bf16.msra.mxu0 %v3026_v10  ;;  %880 = vmatpush1.bf16.msra.mxu1 %v3043_v13 }
 0x11b   :  { %840 = vmatprep.subr.bf16.mxu0 %v3037_v12  ;;  %881 = vmatprep.subr.bf16.mxu1 %v3049_v14 }
 0x11e   :  { %841 = vmatpush1.bf16.msra.mxu0 %v3055_v15  ;;  %882 = vmatpush1.bf16.msra.mxu1 %v3067_v17 }
 0x11f   :  { %842 = vmatprep.subr.bf16.mxu0 %v3061_v16  ;;  %883 = vmatprep.subr.bf16.mxu1 %v3073_v18 }
 0x122   :  { %843 = vmatpush1.bf16.msra.mxu0 %v3079_v19  ;;  %884 = vmatpush1.bf16.msra.mxu1 %v3091_v21 }
 0x123   :  { %844 = vmatprep.subr.bf16.mxu0 %v3085_v20  ;;  %885 = vmatprep.subr.bf16.mxu1 %v3097_v22 }
 0x126   :  { %845 = vmatpush1.bf16.msra.mxu0 %v3103_v23  ;;  %886 = vmatpush1.bf16.msra.mxu1 %v3115_v25 }
 0x127   :  { %846 = vmatprep.subr.bf16.mxu0 %v3109_v24  ;;  %887 = vmatprep.subr.bf16.mxu1 %v3125_v27 }
 0x12a   :  { %847 = vmatpush1.bf16.msra.mxu0 %v3120_v26  ;;  %888 = vmatpush1.bf16.msra.mxu1 %v3137_v29 }
 0x12b   :  { %848 = vmatprep.subr.bf16.mxu0 %v3131_v28  ;;  %889 = vmatprep.subr.bf16.mxu1 %v3143_v30 }
 0x12e   :  { %849 = vmatpush1.bf16.msra.mxu0 %v3149_v31  ;;  %890 = vmatpush1.bf16.msra.mxu1 %v3159_v33 }
 0x12f   :  { %1138 = vmatprep.subr.bf16.mxu0 %v2972_v0  ;;  %1179 = vmatprep.subr.bf16.mxu1 %v2985_v3  ;;  %v2504_v0 = vld [vmem:[%s3716_s0 + $0x30] sm:$0xff] }
 0x1d1   :  { %v564_v41 = vpop.f32.mrf.mxu0  ;;  %v605_v42 = vpop.f32.mrf.mxu1 }
 0x1d2   :  { %v612_v44 = vadd.f32 %v2502_v40, %v564_v41  ;;  %v614_v53 = vadd.f32 %v2504_v0, %v605_v42  ;;  %v3342_v0 = vld [vmem:[%s3714_s1 + $0xe0] ss:$16 sps:$4 sm:$0xff]  }
 0x1d3   :  { %v566_v45 = vpop.f32.mrf.mxu0  ;;  %v607_v46 = vpop.f32.mrf.mxu1 }
 0x1d4   :  { %v616_v47 = vmul.f32 0.5, %v612_v44  ;;  %v613_v48 = vadd.f32 %v2503_v43, %v566_v45  ;;  %v615_v55 = vadd.f32 %v2505_v54, %v607_v46  ;;  %v3385_v54 = vld [vmem:[%s3714_s1 + $0xac] ss:$16 sps:$4 sm:$0xff]  }
 0x1d5   :  { %v568_v3 = vpop.f32.mrf.mxu0  ;;  %v609_v49 = vpop.f32.mrf.mxu1 }
 0x1d6   :  { %2868 = vtanh.f32 %v616_v47  ;;  %v620_v50 = vmul.f32 0.5, %v613_v48  ;;  %v625_v56 = vmul.f32 0.5, %v615_v55  ;;  %v3332_v47 = vld [vmem:[%s3714_s1 + $0xe4] ss:$16 sps:$4 sm:$0xff]   ;;  %v3337_v48 = vld [vmem:[%s3714_s1 + $0xec] ss:$16 sps:$4 sm:$0xff]  }
 0x1d7   :  { %v569_v51 = vpop.f32.mrf.mxu0  ;;  %v610_v52 = vpop.f32.mrf.mxu1  ;;  %v3347_v3 = vld [vmem:[%s3714_s1 + $0xe8] ss:$16 sps:$4 sm:$0xff]   ;;  %v3356_v49 = vld [vmem:[%s3714_s1 + $0xc4] ss:$16 sps:$4 sm:$0xff]   ;;  %v3390_v55 = vld [vmem:[%s3714_s1 + $0xa0] ss:$16 sps:$4 sm:$0xff]  }
 0x1d8   :  { %2870 = vtanh.f32 %v620_v50  ;;  %v3361_v50 = vld [vmem:[%s3714_s1 + $0xcc] ss:$16 sps:$4 sm:$0xff]   ;;  %v3366_v51 = vld [vmem:[%s3714_s1 + $0xc0] ss:$16 sps:$4 sm:$0xff]   ;;  %v3371_v52 = vld [vmem:[%s3714_s1 + $0xc8] ss:$16 sps:$4 sm:$0xff]  }
 0x1d9   :  { %2872 = vtanh.f32 %v614_v53  ;;  %v3380_v53 = vld [vmem:[%s3714_s1 + $0xa4] ss:$16 sps:$4 sm:$0xff]  }
 0x1da   :  { %2874 = vtanh.f32 %v625_v56  ;;  %v3395_v56 = vld [vmem:[%s3714_s1 + $0xa8] ss:$16 sps:$4 sm:$0xff]  }
 0x1e3   :  { %v2869_v57 = vpop.eup %2868 }
 0x1e4   :  { %v618_v58 = vmul.f32 0.5, %v2869_v57  ;;  %v3404_v57 = vld [vmem:[%s3714_s1 + $0x84] ss:$16 sps:$4 sm:$0xff]  }
 0x1e5   :  { %v2871_v59 = vpop.eup %2870 }
 0x1e6   :  { %v619_v60 = vadd.f32 0.5, %v618_v58  ;;  %v622_v61 = vmul.f32 0.5, %v2871_v59  ;;  %v2873_v63 = vpop.eup %2872  ;;  %v3409_v58 = vld [vmem:[%s3714_s1 + $0x8c] ss:$16 sps:$4 sm:$0xff]   ;;  %v3414_v59 = vld [vmem:[%s3714_s1 + $0x80] ss:$16 sps:$4 sm:$0xff]  }
 0x1e7   :  { %v2875_v37 = vpop.eup %2874 }
 0x1e8   :  { %v623_v62 = vadd.f32 0.5, %v622_v61  ;;  %v630_v35 = vmul.f32 %v2873_v63, %v619_v60  ;;  %v627_v38 = vmul.f32 0.5, %v2875_v37  ;;  %v3419_v60 = vld [vmem:[%s3714_s1 + $0x88] ss:$16 sps:$4 sm:$0xff]   ;;  %v3428_v61 = vld [vmem:[%s3714_s1 + $0x64] ss:$16 sps:$4 sm:$0xff]  }
 0x1e9   :  { %v3438_v63 = vld [vmem:[%s3714_s1 + $0x60] ss:$16 sps:$4 sm:$0xff]  }
 0x1ea   :  { %v629_v34 = vmul.f32 %v623_v62, %v3217_v32  ;;  %v628_v39 = vadd.f32 0.5, %v627_v38  ;;  %v3433_v62 = vld [vmem:[%s3714_s1 + $0x6c] ss:$16 sps:$4 sm:$0xff]   ;;  %v3462_v37 = vld [vmem:[%s3714_s1 + $0x40] ss:$16 sps:$4 sm:$0xff]  }
 0x1eb   :  { %v3467_v38 = vld [vmem:[%s3714_s1 + $0x48] ss:$16 sps:$4 sm:$0xff]  }
 0x1ec   :  { %v3270_v36 = vadd.f32 %v630_v35, %v629_v34  ;;  %v3443_v34 = vld [vmem:[%s3714_s1 + $0x68] ss:$16 sps:$4 sm:$0xff]   ;;  %v3452_v35 = vld [vmem:[%s3714_s1 + $0x44] ss:$16 sps:$4 sm:$0xff]  }
 0x1ee   :  { %2876 = vtanh.f32 %v3270_v36 }
 0x1fb   :  { %v2877_v40 = vpop.eup %2876 }
 0x1fc   :  { %v633_v41 = vmul.f32 %v2877_v40, %v628_v39  ;;  %v3476_v39 = vld [vmem:[%s3714_s1 + $0x24] ss:$16 sps:$4 sm:$0xff]   ;;  %v3481_v40 = vld [vmem:[%s3714_s1 + $0x2c] ss:$16 sps:$4 sm:$0xff]  }
 0x1fe   :  { %2538 = vst [vmem:[%s3718_s4 + $0x8] sm:$0xff] %v633_v41  ;;  %v641_v42 = vpack.c.bf16 %v633_v41, %v633_v41  ;;  %v3486_v41 = vld [vmem:[%s3714_s1 + $0x20] ss:$16 sps:$4 sm:$0xff]  }
 0x200   :  { %867 = vmatmul.mubr.bf16.vlgmr.msra.gmra.mxu0 %v641_v42  ;;  %908 = vmatmul.mubr.bf16.vlgmr.msra.gmra.mxu1 %v641_v42  ;;  %v3491_v42 = vld [vmem:[%s3714_s1 + $0x28] ss:$16 sps:$4 sm:$0xff]  }
 0x201   :  { %1139 = vmatpush1.bf16.msra.mxu0 %v2979_v2  ;;  %1180 = vmatpush1.bf16.msra.mxu1 %v2990_v4  ;;  %v2539_v2 = vld [vmem:[%s3716_s0 + $0x40] sm:$0xff] }
 0x202   :  { %1140 = vmatprep.subr.bf16.mxu0 %v2996_v5  ;;  %1181 = vmatprep.subr.bf16.mxu1 %v3007_v7 }
 0x203   :  { %1170 = vmatprep.mubr.bf16.mxu0 %v2938_v1  ;;  %1211 = vmatprep.mubr.bf16.mxu1 %v2938_v1 }
 0x205   :  { %1141 = vmatpush1.bf16.msra.mxu0 %v3001_v6  ;;  %1182 = vmatpush1.bf16.msra.mxu1 %v3014_v8  ;;  %v2540_v6 = vld [vmem:[%s3716_s0 + $0x48] sm:$0xff] }
 0x206   :  { %1142 = vmatprep.subr.bf16.mxu0 %v3020_v9  ;;  %1183 = vmatprep.subr.bf16.mxu1 %v3031_v11 }
 0x209   :  { %1143 = vmatpush1.bf16.msra.mxu0 %v3026_v10  ;;  %1184 = vmatpush1.bf16.msra.mxu1 %v3043_v13 }
 0x20a   :  { %1144 = vmatprep.subr.bf16.mxu0 %v3037_v12  ;;  %1185 = vmatprep.subr.bf16.mxu1 %v3049_v14  ;;  %v2541_v12 = vld [vmem:[%s3716_s0 + $0x50] sm:$0xff] }
 0x20d   :  { %1145 = vmatpush1.bf16.msra.mxu0 %v3055_v15  ;;  %1186 = vmatpush1.bf16.msra.mxu1 %v3067_v17 }
 0x20e   :  { %1146 = vmatprep.subr.bf16.mxu0 %v3061_v16  ;;  %1187 = vmatprep.subr.bf16.mxu1 %v3073_v18 }
 0x211   :  { %1147 = vmatpush1.bf16.msra.mxu0 %v3079_v19  ;;  %1188 = vmatpush1.bf16.msra.mxu1 %v3091_v21  ;;  %v2542_v19 = vld [vmem:[%s3716_s0 + $0x58] sm:$0xff] }
 0x212   :  { %1148 = vmatprep.subr.bf16.mxu0 %v3085_v20  ;;  %1189 = vmatprep.subr.bf16.mxu1 %v3097_v22 }
 0x215   :  { %1149 = vmatpush1.bf16.msra.mxu0 %v3103_v23  ;;  %1190 = vmatpush1.bf16.msra.mxu1 %v3115_v25 }
 0x216   :  { %1150 = vmatprep.subr.bf16.mxu0 %v3109_v24  ;;  %1191 = vmatprep.subr.bf16.mxu1 %v3125_v27 }
 0x219   :  { %1151 = vmatpush1.bf16.msra.mxu0 %v3120_v26  ;;  %1192 = vmatpush1.bf16.msra.mxu1 %v3137_v29 }
 0x21a   :  { %1152 = vmatprep.subr.bf16.mxu0 %v3131_v28  ;;  %1193 = vmatprep.subr.bf16.mxu1 %v3143_v30 }
 0x21d   :  { %1153 = vmatpush1.bf16.msra.mxu0 %v3149_v31  ;;  %1194 = vmatpush1.bf16.msra.mxu1 %v3159_v33 }
 0x21e   :  { %1442 = vmatprep.subr.bf16.mxu0 %v3332_v47  ;;  %1483 = vmatprep.subr.bf16.mxu1 %v3337_v48 }
 0x2c0   :  { %v868_v4 = vpop.f32.mrf.mxu0  ;;  %v909_v5 = vpop.f32.mrf.mxu1 }
 0x2c1   :  { %v916_v7 = vadd.f32 %v2539_v2, %v868_v4  ;;  %v918_v18 = vadd.f32 %v2541_v12, %v909_v5  ;;  %v3500_v2 = vld [vmem:[%s3714_s1 + $0x4] ss:$16 sps:$4 sm:$0xff]   ;;  %v3505_v4 = vld [vmem:[%s3714_s1 + $0xc] ss:$16 sps:$4 sm:$0xff]   ;;  %v3510_v5 = vld [vmem:[%s3714_s1] ss:$16 sps:$4 sm:$0xff]  }
 0x2c2   :  { %v870_v8 = vpop.f32.mrf.mxu0  ;;  %v911_v9 = vpop.f32.mrf.mxu1 }
 0x2c3   :  { %v920_v10 = vmul.f32 0.5, %v916_v7  ;;  %v917_v11 = vadd.f32 %v2540_v6, %v870_v8  ;;  %v919_v20 = vadd.f32 %v2542_v19, %v911_v9  ;;  %v3515_v6 = vld [vmem:[%s3714_s1 + $0x8] ss:$16 sps:$4 sm:$0xff]   ;;  %v2576_v7 = vld [vmem:[%s3716_s0 + $0x60] sm:$0xff] }
 0x2c4   :  { %v872_v13 = vpop.f32.mrf.mxu0  ;;  %v913_v14 = vpop.f32.mrf.mxu1 }
 0x2c5   :  { %2878 = vtanh.f32 %v920_v10  ;;  %v924_v15 = vmul.f32 0.5, %v917_v11  ;;  %v929_v21 = vmul.f32 0.5, %v919_v20  ;;  %v2577_v10 = vld [vmem:[%s3716_s0 + $0x68] sm:$0xff] }
 0x2c6   :  { %v873_v16 = vpop.f32.mrf.mxu0  ;;  %v914_v17 = vpop.f32.mrf.mxu1 }
 0x2c7   :  { %2880 = vtanh.f32 %v924_v15  ;;  %v2578_v16 = vld [vmem:[%s3716_s0 + $0x70] sm:$0xff] }
 0x2c8   :  { %2882 = vtanh.f32 %v918_v18 }
 0x2c9   :  { %2884 = vtanh.f32 %v929_v21 }
 0x2d2   :  { %v2879_v22 = vpop.eup %2878 }
 0x2d3   :  { %v922_v23 = vmul.f32 0.5, %v2879_v22 }
 0x2d4   :  { %v2881_v24 = vpop.eup %2880 }
 0x2d5   :  { %v923_v25 = vadd.f32 0.5, %v922_v23  ;;  %v926_v26 = vmul.f32 0.5, %v2881_v24  ;;  %v2883_v28 = vpop.eup %2882  ;;  %v2579_v23 = vld [vmem:[%s3716_s0 + $0x78] sm:$0xff] }
 0x2d6   :  { %v2885_v33 = vpop.eup %2884 }
 0x2d7   :  { %v927_v27 = vadd.f32 0.5, %v926_v26  ;;  %v934_v30 = vmul.f32 %v2883_v28, %v923_v25  ;;  %v931_v32 = vmul.f32 0.5, %v2885_v33 }
 0x2d9   :  { %v933_v29 = vmul.f32 %v927_v27, %v3270_v36  ;;  %v932_v43 = vadd.f32 0.5, %v931_v32  ;;  %v3457_v36 = vld [vmem:[%s3714_s1 + $0x4c] ss:$16 sps:$4 sm:$0xff]  }
 0x2db   :  { %v3321_v31 = vadd.f32 %v934_v30, %v933_v29 }
 0x2dd   :  { %2886 = vtanh.f32 %v3321_v31 }
 0x2ea   :  { %v2887_v44 = vpop.eup %2886 }
 0x2eb   :  { %v937_v45 = vmul.f32 %v2887_v44, %v932_v43 }
 0x2ed   :  { %2575 = vst [vmem:[%s3718_s4 + $0x10] sm:$0xff] %v937_v45  ;;  %v945_v46 = vpack.c.bf16 %v937_v45, %v937_v45 }
 0x2ef   :  { %1171 = vmatmul.mubr.bf16.vlgmr.msra.gmra.mxu0 %v945_v46  ;;  %1212 = vmatmul.mubr.bf16.vlgmr.msra.gmra.mxu1 %v945_v46 }
 0x2f0   :  { %1474 = vmatprep.mubr.bf16.mxu0 %v2938_v1  ;;  %1515 = vmatprep.mubr.bf16.mxu1 %v2938_v1 }
 0x2f1   :  { %1443 = vmatpush1.bf16.msra.mxu0 %v3342_v0  ;;  %1484 = vmatpush1.bf16.msra.mxu1 %v3347_v3 }
 0x2f2   :  { %1444 = vmatprep.subr.bf16.mxu0 %v3356_v49  ;;  %1485 = vmatprep.subr.bf16.mxu1 %v3361_v50 }
 0x2f5   :  { %1445 = vmatpush1.bf16.msra.mxu0 %v3366_v51  ;;  %1486 = vmatpush1.bf16.msra.mxu1 %v3371_v52 }
 0x2f6   :  { %1446 = vmatprep.subr.bf16.mxu0 %v3380_v53  ;;  %1487 = vmatprep.subr.bf16.mxu1 %v3385_v54 }
 0x2f9   :  { %1447 = vmatpush1.bf16.msra.mxu0 %v3390_v55  ;;  %1488 = vmatpush1.bf16.msra.mxu1 %v3395_v56 }
 0x2fa   :  { %1448 = vmatprep.subr.bf16.mxu0 %v3404_v57  ;;  %1489 = vmatprep.subr.bf16.mxu1 %v3409_v58 }
 0x2fd   :  { %1449 = vmatpush1.bf16.msra.mxu0 %v3414_v59  ;;  %1490 = vmatpush1.bf16.msra.mxu1 %v3419_v60 }
 0x2fe   :  { %1450 = vmatprep.subr.bf16.mxu0 %v3428_v61  ;;  %1491 = vmatprep.subr.bf16.mxu1 %v3433_v62 }
 0x301   :  { %1451 = vmatpush1.bf16.msra.mxu0 %v3438_v63  ;;  %1492 = vmatpush1.bf16.msra.mxu1 %v3443_v34 }
 0x302   :  { %1452 = vmatprep.subr.bf16.mxu0 %v3452_v35  ;;  %1493 = vmatprep.subr.bf16.mxu1 %v3457_v36 }
 0x305   :  { %1453 = vmatpush1.bf16.msra.mxu0 %v3462_v37  ;;  %1494 = vmatpush1.bf16.msra.mxu1 %v3467_v38 }
 0x306   :  { %1454 = vmatprep.subr.bf16.mxu0 %v3476_v39  ;;  %1495 = vmatprep.subr.bf16.mxu1 %v3481_v40 }
 0x309   :  { %1455 = vmatpush1.bf16.msra.mxu0 %v3486_v41  ;;  %1496 = vmatpush1.bf16.msra.mxu1 %v3491_v42 }
 0x30a   :  { %1456 = vmatprep.subr.bf16.mxu0 %v3500_v2  ;;  %1497 = vmatprep.subr.bf16.mxu1 %v3505_v4 }
 0x30d   :  { %1457 = vmatpush1.bf16.msra.mxu0 %v3510_v5  ;;  %1498 = vmatpush1.bf16.msra.mxu1 %v3515_v6 }
 0x30e   :  { %1746 = vmatprep.subr.bf16.mxu0 %v3332_v47  ;;  %1787 = vmatprep.subr.bf16.mxu1 %v3337_v48 }
 0x3af   :  { %v1172_v8 = vpop.f32.mrf.mxu0  ;;  %v1213_v9 = vpop.f32.mrf.mxu1 }
 0x3b0   :  { %v1220_v11 = vadd.f32 %v2576_v7, %v1172_v8  ;;  %v1222_v22 = vadd.f32 %v2578_v16, %v1213_v9 }
 0x3b1   :  { %v1174_v12 = vpop.f32.mrf.mxu0  ;;  %v1215_v13 = vpop.f32.mrf.mxu1 }
 0x3b2   :  { %v1224_v14 = vmul.f32 0.5, %v1220_v11  ;;  %v1221_v15 = vadd.f32 %v2577_v10, %v1174_v12  ;;  %v1223_v24 = vadd.f32 %v2579_v23, %v1215_v13 }
 0x3b3   :  { %v1176_v17 = vpop.f32.mrf.mxu0  ;;  %v1217_v18 = vpop.f32.mrf.mxu1 }
 0x3b4   :  { %2888 = vtanh.f32 %v1224_v14  ;;  %v1228_v19 = vmul.f32 0.5, %v1221_v15  ;;  %v1233_v25 = vmul.f32 0.5, %v1223_v24  ;;  %v2614_v14 = vld [vmem:[%s3716_s0 + $0x88] sm:$0xff] }
 0x3b5   :  { %v1177_v20 = vpop.f32.mrf.mxu0  ;;  %v1218_v21 = vpop.f32.mrf.mxu1 }
 0x3b6   :  { %2890 = vtanh.f32 %v1228_v19  ;;  %v2615_v20 = vld [vmem:[%s3716_s0 + $0x90] sm:$0xff] }
 0x3b7   :  { %2892 = vtanh.f32 %v1222_v22 }
 0x3b8   :  { %2894 = vtanh.f32 %v1233_v25 }
 0x3c1   :  { %v2889_v26 = vpop.eup %2888 }
 0x3c2   :  { %v1226_v27 = vmul.f32 0.5, %v2889_v26 }
 0x3c3   :  { %v2891_v28 = vpop.eup %2890 }
 0x3c4   :  { %v1227_v29 = vadd.f32 0.5, %v1226_v27  ;;  %v1230_v30 = vmul.f32 0.5, %v2891_v28  ;;  %v2893_v32 = vpop.eup %2892  ;;  %v2616_v27 = vld [vmem:[%s3716_s0 + $0x98] sm:$0xff] }
 0x3c5   :  { %v2895_v46 = vpop.eup %2894 }
 0x3c6   :  { %v1231_v33 = vadd.f32 0.5, %v1230_v30  ;;  %v1238_v44 = vmul.f32 %v2893_v32, %v1227_v29  ;;  %v1235_v7 = vmul.f32 0.5, %v2895_v46 }
 0x3c8   :  { %v1237_v43 = vmul.f32 %v1231_v33, %v3321_v31  ;;  %v1236_v8 = vadd.f32 0.5, %v1235_v7  ;;  %v2613_v31 = vld [vmem:[%s3716_s0 + $0x80] sm:$0xff] }
 0x3ca   :  { %v3536_v45 = vadd.f32 %v1238_v44, %v1237_v43 }
 0x3cc   :  { %2896 = vtanh.f32 %v3536_v45 }
 0x3d9   :  { %v2897_v9 = vpop.eup %2896 }
 0x3da   :  { %v1241_v10 = vmul.f32 %v2897_v9, %v1236_v8 }
 0x3dc   :  { %2612 = vst [vmem:[%s3718_s4 + $0x18] sm:$0xff] %v1241_v10  ;;  %v1249_v11 = vpack.c.bf16 %v1241_v10, %v1241_v10 }
 0x3de   :  { %1475 = vmatmul.mubr.bf16.vlgmr.msra.gmra.mxu0 %v1249_v11  ;;  %1516 = vmatmul.mubr.bf16.vlgmr.msra.gmra.mxu1 %v1249_v11 }
 0x3df   :  { %1747 = vmatpush1.bf16.msra.mxu0 %v3342_v0  ;;  %1788 = vmatpush1.bf16.msra.mxu1 %v3347_v3 }
 0x3e0   :  { %1748 = vmatprep.subr.bf16.mxu0 %v3356_v49  ;;  %1789 = vmatprep.subr.bf16.mxu1 %v3361_v50 }
 0x3e1   :  { %1778 = vmatprep.mubr.bf16.mxu0 %v2938_v1  ;;  %1819 = vmatprep.mubr.bf16.mxu1 %v2938_v1 }
 0x3e3   :  { %1749 = vmatpush1.bf16.msra.mxu0 %v3366_v51  ;;  %1790 = vmatpush1.bf16.msra.mxu1 %v3371_v52 }
 0x3e4   :  { %1750 = vmatprep.subr.bf16.mxu0 %v3380_v53  ;;  %1791 = vmatprep.subr.bf16.mxu1 %v3385_v54 }
 0x3e7   :  { %1751 = vmatpush1.bf16.msra.mxu0 %v3390_v55  ;;  %1792 = vmatpush1.bf16.msra.mxu1 %v3395_v56 }
 0x3e8   :  { %1752 = vmatprep.subr.bf16.mxu0 %v3404_v57  ;;  %1793 = vmatprep.subr.bf16.mxu1 %v3409_v58 }
 0x3eb   :  { %1753 = vmatpush1.bf16.msra.mxu0 %v3414_v59  ;;  %1794 = vmatpush1.bf16.msra.mxu1 %v3419_v60 }
 0x3ec   :  { %1754 = vmatprep.subr.bf16.mxu0 %v3428_v61  ;;  %1795 = vmatprep.subr.bf16.mxu1 %v3433_v62 }
 0x3ef   :  { %1755 = vmatpush1.bf16.msra.mxu0 %v3438_v63  ;;  %1796 = vmatpush1.bf16.msra.mxu1 %v3443_v34 }
 0x3f0   :  { %1756 = vmatprep.subr.bf16.mxu0 %v3452_v35  ;;  %1797 = vmatprep.subr.bf16.mxu1 %v3457_v36 }
 0x3f3   :  { %1757 = vmatpush1.bf16.msra.mxu0 %v3462_v37  ;;  %1798 = vmatpush1.bf16.msra.mxu1 %v3467_v38 }
 0x3f4   :  { %1758 = vmatprep.subr.bf16.mxu0 %v3476_v39  ;;  %1799 = vmatprep.subr.bf16.mxu1 %v3481_v40 }
 0x3f7   :  { %1759 = vmatpush1.bf16.msra.mxu0 %v3486_v41  ;;  %1800 = vmatpush1.bf16.msra.mxu1 %v3491_v42 }
 0x3f8   :  { %1760 = vmatprep.subr.bf16.mxu0 %v3500_v2  ;;  %1801 = vmatprep.subr.bf16.mxu1 %v3505_v4 }
 0x3fb   :  { %1761 = vmatpush1.bf16.msra.mxu0 %v3510_v5  ;;  %1802 = vmatpush1.bf16.msra.mxu1 %v3515_v6 }
 0x3fc   :  { %2050 = vmatprep.subr.bf16.mxu0 %v3332_v47  ;;  %2091 = vmatprep.subr.bf16.mxu1 %v3337_v48 }
 0x49e   :  { %v1476_v12 = vpop.f32.mrf.mxu0  ;;  %v1517_v13 = vpop.f32.mrf.mxu1 }
 0x49f   :  { %v1524_v15 = vadd.f32 %v2613_v31, %v1476_v12  ;;  %v1526_v26 = vadd.f32 %v2615_v20, %v1517_v13 }
 0x4a0   :  { %v1478_v16 = vpop.f32.mrf.mxu0  ;;  %v1519_v17 = vpop.f32.mrf.mxu1 }
 0x4a1   :  { %v1528_v18 = vmul.f32 0.5, %v1524_v15  ;;  %v1525_v19 = vadd.f32 %v2614_v14, %v1478_v16  ;;  %v1527_v28 = vadd.f32 %v2616_v27, %v1519_v17 }
 0x4a2   :  { %v1480_v21 = vpop.f32.mrf.mxu0  ;;  %v1521_v22 = vpop.f32.mrf.mxu1 }
 0x4a3   :  { %2898 = vtanh.f32 %v1528_v18  ;;  %v1532_v23 = vmul.f32 0.5, %v1525_v19  ;;  %v1537_v29 = vmul.f32 0.5, %v1527_v28  ;;  %v2651_v18 = vld [vmem:[%s3716_s0 + $0xa8] sm:$0xff] }
 0x4a4   :  { %v1481_v24 = vpop.f32.mrf.mxu0  ;;  %v1522_v25 = vpop.f32.mrf.mxu1 }
 0x4a5   :  { %2900 = vtanh.f32 %v1532_v23 }
 0x4a6   :  { %2902 = vtanh.f32 %v1526_v26 }
 0x4a7   :  { %2904 = vtanh.f32 %v1537_v29  ;;  %v2653_v29 = vld [vmem:[%s3716_s0 + $0xb8] sm:$0xff] }
 0x4b0   :  { %v2899_v30 = vpop.eup %2898 }
 0x4b1   :  { %v1530_v33 = vmul.f32 0.5, %v2899_v30 }
 0x4b2   :  { %v2901_v32 = vpop.eup %2900 }
 0x4b3   :  { %v1531_v43 = vadd.f32 0.5, %v1530_v33  ;;  %v1534_v44 = vmul.f32 0.5, %v2901_v32  ;;  %v2903_v7 = vpop.eup %2902 }
 0x4b4   :  { %v2905_v11 = vpop.eup %2904 }
 0x4b5   :  { %v1535_v46 = vadd.f32 0.5, %v1534_v44  ;;  %v1542_v9 = vmul.f32 %v2903_v7, %v1531_v43  ;;  %v1539_v31 = vmul.f32 0.5, %v2905_v11 }
 0x4b7   :  { %v1541_v8 = vmul.f32 %v1535_v46, %v3536_v45  ;;  %v1540_v12 = vadd.f32 0.5, %v1539_v31  ;;  %v2650_v45 = vld [vmem:[%s3716_s0 + $0xa0] sm:$0xff] }
 0x4b9   :  { %v3589_v10 = vadd.f32 %v1542_v9, %v1541_v8 }
 0x4bb   :  { %2906 = vtanh.f32 %v3589_v10 }
 0x4c8   :  { %v2907_v13 = vpop.eup %2906 }
 0x4c9   :  { %v1545_v14 = vmul.f32 %v2907_v13, %v1540_v12 }
 0x4cb   :  { %2649 = vst [vmem:[%s3718_s4 + $0x20] sm:$0xff] %v1545_v14  ;;  %v1553_v15 = vpack.c.bf16 %v1545_v14, %v1545_v14 }
 0x4cd   :  { %1779 = vmatmul.mubr.bf16.vlgmr.msra.gmra.mxu0 %v1553_v15  ;;  %1820 = vmatmul.mubr.bf16.vlgmr.msra.gmra.mxu1 %v1553_v15 }
 0x4ce   :  { %2051 = vmatpush1.bf16.msra.mxu0 %v3342_v0  ;;  %2092 = vmatpush1.bf16.msra.mxu1 %v3347_v3 }
 0x4cf   :  { %2052 = vmatprep.subr.bf16.mxu0 %v3356_v49  ;;  %2093 = vmatprep.subr.bf16.mxu1 %v3361_v50 }
 0x4d0   :  { %2082 = vmatprep.mubr.bf16.mxu0 %v2938_v1  ;;  %2123 = vmatprep.mubr.bf16.mxu1 %v2938_v1 }
 0x4d2   :  { %2053 = vmatpush1.bf16.msra.mxu0 %v3366_v51  ;;  %2094 = vmatpush1.bf16.msra.mxu1 %v3371_v52 }
 0x4d3   :  { %2054 = vmatprep.subr.bf16.mxu0 %v3380_v53  ;;  %2095 = vmatprep.subr.bf16.mxu1 %v3385_v54 }
 0x4d6   :  { %2055 = vmatpush1.bf16.msra.mxu0 %v3390_v55  ;;  %2096 = vmatpush1.bf16.msra.mxu1 %v3395_v56 }
 0x4d7   :  { %2056 = vmatprep.subr.bf16.mxu0 %v3404_v57  ;;  %2097 = vmatprep.subr.bf16.mxu1 %v3409_v58 }
 0x4da   :  { %2057 = vmatpush1.bf16.msra.mxu0 %v3414_v59  ;;  %2098 = vmatpush1.bf16.msra.mxu1 %v3419_v60 }
 0x4db   :  { %2058 = vmatprep.subr.bf16.mxu0 %v3428_v61  ;;  %2099 = vmatprep.subr.bf16.mxu1 %v3433_v62 }
 0x4de   :  { %2059 = vmatpush1.bf16.msra.mxu0 %v3438_v63  ;;  %2100 = vmatpush1.bf16.msra.mxu1 %v3443_v34 }
 0x4df   :  { %2060 = vmatprep.subr.bf16.mxu0 %v3452_v35  ;;  %2101 = vmatprep.subr.bf16.mxu1 %v3457_v36 }
 0x4e2   :  { %2061 = vmatpush1.bf16.msra.mxu0 %v3462_v37  ;;  %2102 = vmatpush1.bf16.msra.mxu1 %v3467_v38 }
 0x4e3   :  { %2062 = vmatprep.subr.bf16.mxu0 %v3476_v39  ;;  %2103 = vmatprep.subr.bf16.mxu1 %v3481_v40 }
 0x4e6   :  { %2063 = vmatpush1.bf16.msra.mxu0 %v3486_v41  ;;  %2104 = vmatpush1.bf16.msra.mxu1 %v3491_v42 }
 0x4e7   :  { %2064 = vmatprep.subr.bf16.mxu0 %v3500_v2  ;;  %2105 = vmatprep.subr.bf16.mxu1 %v3505_v4 }
 0x4ea   :  { %2065 = vmatpush1.bf16.msra.mxu0 %v3510_v5  ;;  %2106 = vmatpush1.bf16.msra.mxu1 %v3515_v6 }
 0x4eb   :  { %2354 = vmatprep.subr.bf16.mxu0 %v3332_v47  ;;  %2395 = vmatprep.subr.bf16.mxu1 %v3337_v48  ;;  %v2652_v47 = vld [vmem:[%s3716_s0 + $0xb0] sm:$0xff] }
 0x58d   :  { %v1780_v16 = vpop.f32.mrf.mxu0  ;;  %v1821_v17 = vpop.f32.mrf.mxu1 }
 0x58e   :  { %v1828_v19 = vadd.f32 %v2650_v45, %v1780_v16  ;;  %v1830_v28 = vadd.f32 %v2652_v47, %v1821_v17  ;;  %v2725_v47 = vld [vmem:[%s3716_s0 + $0xe8] sm:$0xff] }
 0x58f   :  { %v1782_v20 = vpop.f32.mrf.mxu0  ;;  %v1823_v21 = vpop.f32.mrf.mxu1 }
 0x590   :  { %v1832_v22 = vmul.f32 0.5, %v1828_v19  ;;  %v1829_v23 = vadd.f32 %v2651_v18, %v1782_v20  ;;  %v1831_v30 = vadd.f32 %v2653_v29, %v1823_v21  ;;  %v2724_v21 = vld [vmem:[%s3716_s0 + $0xe0] sm:$0xff] }
 0x591   :  { %v1784_v48 = vpop.f32.mrf.mxu0  ;;  %v1825_v24 = vpop.f32.mrf.mxu1 }
 0x592   :  { %2908 = vtanh.f32 %v1832_v22  ;;  %v1836_v25 = vmul.f32 0.5, %v1829_v23  ;;  %v1841_v33 = vmul.f32 0.5, %v1831_v30 }
 0x593   :  { %v1785_v26 = vpop.f32.mrf.mxu0  ;;  %v1826_v27 = vpop.f32.mrf.mxu1 }
 0x594   :  { %2910 = vtanh.f32 %v1836_v25 }
 0x595   :  { %2912 = vtanh.f32 %v1830_v28  ;;  %v2726_v28 = vld [vmem:[%s3716_s0 + $0xf0] sm:$0xff] }
 0x596   :  { %2914 = vtanh.f32 %v1841_v33 }
 0x59f   :  { %v2909_v32 = vpop.eup %2908 }
 0x5a0   :  { %v1834_v43 = vmul.f32 0.5, %v2909_v32 }
 0x5a1   :  { %v2911_v44 = vpop.eup %2910 }
 0x5a2   :  { %v1835_v46 = vadd.f32 0.5, %v1834_v43  ;;  %v1838_v7 = vmul.f32 0.5, %v2911_v44  ;;  %v2913_v9 = vpop.eup %2912 }
 0x5a3   :  { %v2915_v13 = vpop.eup %2914 }
 0x5a4   :  { %v1839_v8 = vadd.f32 0.5, %v1838_v7  ;;  %v1846_v31 = vmul.f32 %v2913_v9, %v1835_v46  ;;  %v1843_v14 = vmul.f32 0.5, %v2915_v13  ;;  %v2727_v46 = vld [vmem:[%s3716_s0 + $0xf8] sm:$0xff] }
 0x5a6   :  { %v1845_v11 = vmul.f32 %v1839_v8, %v3589_v10  ;;  %v1844_v15 = vadd.f32 0.5, %v1843_v14 }
 0x5a8   :  { %v3642_v12 = vadd.f32 %v1846_v31, %v1845_v11 }
 0x5aa   :  { %2916 = vtanh.f32 %v3642_v12 }
 0x5b7   :  { %v2917_v45 = vpop.eup %2916 }
 0x5b8   :  { %v1849_v16 = vmul.f32 %v2917_v45, %v1844_v15 }
 0x5ba   :  { %2686 = vst [vmem:[%s3718_s4 + $0x28] sm:$0xff] %v1849_v16  ;;  %v1857_v17 = vpack.c.bf16 %v1849_v16, %v1849_v16 }
 0x5bc   :  { %2083 = vmatmul.mubr.bf16.vlgmr.msra.gmra.mxu0 %v1857_v17  ;;  %2124 = vmatmul.mubr.bf16.vlgmr.msra.gmra.mxu1 %v1857_v17 }
 0x5bd   :  { %2355 = vmatpush1.bf16.msra.mxu0 %v3342_v0  ;;  %2396 = vmatpush1.bf16.msra.mxu1 %v3347_v3 }
 0x5be   :  { %2356 = vmatprep.subr.bf16.mxu0 %v3356_v49  ;;  %2397 = vmatprep.subr.bf16.mxu1 %v3361_v50  ;;  %v2688_v49 = vld [vmem:[%s3716_s0 + $0xc8] sm:$0xff] }
 0x5bf   :  { %2386 = vmatprep.mubr.bf16.mxu0 %v2938_v1  ;;  %2427 = vmatprep.mubr.bf16.mxu1 %v2938_v1  ;;  %v2687_v1 = vld [vmem:[%s3716_s0 + $0xc0] sm:$0xff] }
 0x5c1   :  { %2357 = vmatpush1.bf16.msra.mxu0 %v3366_v51  ;;  %2398 = vmatpush1.bf16.msra.mxu1 %v3371_v52 }
 0x5c2   :  { %2358 = vmatprep.subr.bf16.mxu0 %v3380_v53  ;;  %2399 = vmatprep.subr.bf16.mxu1 %v3385_v54 }
 0x5c5   :  { %2359 = vmatpush1.bf16.msra.mxu0 %v3390_v55  ;;  %2400 = vmatpush1.bf16.msra.mxu1 %v3395_v56  ;;  %v2689_v55 = vld [vmem:[%s3716_s0 + $0xd0] sm:$0xff] }
 0x5c6   :  { %2360 = vmatprep.subr.bf16.mxu0 %v3404_v57  ;;  %2401 = vmatprep.subr.bf16.mxu1 %v3409_v58 }
 0x5c9   :  { %2361 = vmatpush1.bf16.msra.mxu0 %v3414_v59  ;;  %2402 = vmatpush1.bf16.msra.mxu1 %v3419_v60 }
 0x5ca   :  { %2362 = vmatprep.subr.bf16.mxu0 %v3428_v61  ;;  %2403 = vmatprep.subr.bf16.mxu1 %v3433_v62  ;;  %v2690_v62 = vld [vmem:[%s3716_s0 + $0xd8] sm:$0xff] }
 0x5cd   :  { %2363 = vmatpush1.bf16.msra.mxu0 %v3438_v63  ;;  %2404 = vmatpush1.bf16.msra.mxu1 %v3443_v34 }
 0x5ce   :  { %2364 = vmatprep.subr.bf16.mxu0 %v3452_v35  ;;  %2405 = vmatprep.subr.bf16.mxu1 %v3457_v36 }
 0x5d1   :  { %2365 = vmatpush1.bf16.msra.mxu0 %v3462_v37  ;;  %2406 = vmatpush1.bf16.msra.mxu1 %v3467_v38 }
 0x5d2   :  { %2366 = vmatprep.subr.bf16.mxu0 %v3476_v39  ;;  %2407 = vmatprep.subr.bf16.mxu1 %v3481_v40 }
 0x5d5   :  { %2367 = vmatpush1.bf16.msra.mxu0 %v3486_v41  ;;  %2408 = vmatpush1.bf16.msra.mxu1 %v3491_v42 }
 0x5d6   :  { %2368 = vmatprep.subr.bf16.mxu0 %v3500_v2  ;;  %2409 = vmatprep.subr.bf16.mxu1 %v3505_v4 }
 0x5d9   :  { %2369 = vmatpush1.bf16.msra.mxu0 %v3510_v5  ;;  %2410 = vmatpush1.bf16.msra.mxu1 %v3515_v6 }
 0x67c   :  { %v2084_v0 = vpop.f32.mrf.mxu0  ;;  %v2125_v3 = vpop.f32.mrf.mxu1 }
 0x67d   :  { %v2132_v50 = vadd.f32 %v2687_v1, %v2084_v0  ;;  %v2134_v61 = vadd.f32 %v2689_v55, %v2125_v3 }
 0x67e   :  { %v2086_v51 = vpop.f32.mrf.mxu0  ;;  %v2127_v52 = vpop.f32.mrf.mxu1 }
 0x67f   :  { %v2136_v53 = vmul.f32 0.5, %v2132_v50  ;;  %v2133_v54 = vadd.f32 %v2688_v49, %v2086_v51  ;;  %v2135_v63 = vadd.f32 %v2690_v62, %v2127_v52 }
 0x680   :  { %v2088_v56 = vpop.f32.mrf.mxu0  ;;  %v2129_v57 = vpop.f32.mrf.mxu1 }
 0x681   :  { %2918 = vtanh.f32 %v2136_v53  ;;  %v2140_v58 = vmul.f32 0.5, %v2133_v54  ;;  %v2145_v34 = vmul.f32 0.5, %v2135_v63 }
 0x682   :  { %v2089_v59 = vpop.f32.mrf.mxu0  ;;  %v2130_v60 = vpop.f32.mrf.mxu1 }
 0x683   :  { %2920 = vtanh.f32 %v2140_v58 }
 0x684   :  { %2922 = vtanh.f32 %v2134_v61 }
 0x685   :  { %2924 = vtanh.f32 %v2145_v34 }
 0x68e   :  { %v2919_v35 = vpop.eup %2918 }
 0x68f   :  { %v2138_v36 = vmul.f32 0.5, %v2919_v35 }
 0x690   :  { %v2921_v37 = vpop.eup %2920 }
 0x691   :  { %v2139_v38 = vadd.f32 0.5, %v2138_v36  ;;  %v2142_v39 = vmul.f32 0.5, %v2921_v37  ;;  %v2923_v41 = vpop.eup %2922 }
 0x692   :  { %v2925_v5 = vpop.eup %2924 }
 0x693   :  { %v2143_v40 = vadd.f32 0.5, %v2142_v39  ;;  %v2150_v2 = vmul.f32 %v2923_v41, %v2139_v38  ;;  %v2147_v6 = vmul.f32 0.5, %v2925_v5 }
 0x695   :  { %v2149_v42 = vmul.f32 %v2143_v40, %v3642_v12  ;;  %v2148_v10 = vadd.f32 0.5, %v2147_v6 }
 0x697   :  { %v2151_v4 = vadd.f32 %v2150_v2, %v2149_v42 }
 0x699   :  { %2926 = vtanh.f32 %v2151_v4 }
 0x6a6   :  { %v2927_v18 = vpop.eup %2926 }
 0x6a7   :  { %v2153_v19 = vmul.f32 %v2927_v18, %v2148_v10 }
 0x6a9   :  { %2723 = vst [vmem:[%s3718_s4 + $0x30] sm:$0xff] %v2153_v19  ;;  %v2161_v20 = vpack.c.bf16 %v2153_v19, %v2153_v19 }
 0x6ab   :  { %2387 = vmatmul.mubr.bf16.vlgmr.msra.gmra.mxu0 %v2161_v20  ;;  %2428 = vmatmul.mubr.bf16.vlgmr.msra.gmra.mxu1 %v2161_v20 }
 0x76b   :  { %v2388_v22 = vpop.f32.mrf.mxu0  ;;  %v2429_v23 = vpop.f32.mrf.mxu1 }
 0x76c   :  { %v2436_v48 = vadd.f32 %v2724_v21, %v2388_v22  ;;  %v2438_v44 = vadd.f32 %v2726_v28, %v2429_v23 }
 0x76d   :  { %v2390_v24 = vpop.f32.mrf.mxu0  ;;  %v2431_v25 = vpop.f32.mrf.mxu1 }
 0x76e   :  { %v2440_v26 = vmul.f32 0.5, %v2436_v48  ;;  %v2437_v27 = vadd.f32 %v2725_v47, %v2390_v24  ;;  %v2439_v7 = vadd.f32 %v2727_v46, %v2431_v25 }
 0x76f   :  { %v2392_v29 = vpop.f32.mrf.mxu0  ;;  %v2433_v30 = vpop.f32.mrf.mxu1 }
 0x770   :  { %2928 = vtanh.f32 %v2440_v26  ;;  %v2444_v33 = vmul.f32 0.5, %v2437_v27  ;;  %v2449_v8 = vmul.f32 0.5, %v2439_v7 }
 0x771   :  { %v2393_v32 = vpop.f32.mrf.mxu0  ;;  %v2434_v43 = vpop.f32.mrf.mxu1 }
 0x772   :  { %2930 = vtanh.f32 %v2444_v33 }
 0x773   :  { %2932 = vtanh.f32 %v2438_v44 }
 0x774   :  { %2934 = vtanh.f32 %v2449_v8 }
 0x77d   :  { %v2929_v9 = vpop.eup %2928 }
 0x77e   :  { %v2442_v11 = vmul.f32 0.5, %v2929_v9 }
 0x77f   :  { %v2931_v31 = vpop.eup %2930 }
 0x780   :  { %v2443_v12 = vadd.f32 0.5, %v2442_v11  ;;  %v2446_v13 = vmul.f32 0.5, %v2931_v31  ;;  %v2933_v15 = vpop.eup %2932 }
 0x781   :  { %v2935_v1 = vpop.eup %2934 }
 0x782   :  { %v2447_v14 = vadd.f32 0.5, %v2446_v13  ;;  %v2454_v16 = vmul.f32 %v2933_v15, %v2443_v12  ;;  %v2451_v0 = vmul.f32 0.5, %v2935_v1 }
 0x784   :  { %v2453_v45 = vmul.f32 %v2447_v14, %v2151_v4  ;;  %v2452_v3 = vadd.f32 0.5, %v2451_v0 }
 0x786   :  { %v2455_v17 = vadd.f32 %v2454_v16, %v2453_v45 }
 0x788   :  { %2936 = vtanh.f32 %v2455_v17  ;;  %2461 = vst [vmem:[%s3719_s5] sm:$0xff] %v2455_v17 }
 0x795   :  { %v2937_v49 = vpop.eup %2936 }
 0x796   :  { %v2457_v50 = vmul.f32 %v2937_v49, %v2452_v3 }
 0x798   :  { %2760 = vst [vmem:[%s3718_s4 + $0x38] sm:$0xff] %v2457_v50 }

</bundles_post_ra>
